<compile_context>
chip_gen: v7x
topology: tpu7x:2x2x1
jax: 0.10.0
libtpu: 0.0.40
codegen_flags: <defaults>
</compile_context>

<pallas_src>
import functools

import jax
import jax.numpy as jnp
from jax.experimental import pallas as pl
from jax.experimental.pallas import tpu as pltpu


_LPAD = 8  # interior of the h1 scratch starts at this (sublane-aligned) column


# ---------------------------------------------------------------------------
# Fused kernel
# ---------------------------------------------------------------------------
def _bottleneck_kernel(x_top_ref, x_main_ref, x_bot_ref,
                       w1_ref, b1_ref, w2_ref, b2_ref, w3_ref, b3_ref,
                       o_ref, h1_ref, *col_scratch, use_im2col):
    # x_top_ref : (1, W, Cin)    row above the tile (clamped at the top border)
    # x_main_ref: (TH, W, Cin)   the tile's rows (also the residual input)
    # x_bot_ref : (1, W, Cin)    row below the tile (clamped at the bottom border)
    # w*_ref    : BN-scale-folded weights, whole-array VMEM residents
    # b*_ref    : (1, C) f32 folded BN biases
    # o_ref     : (TH, W, Cout)  output row tile
    # h1_ref    : (TH+2, W+LPAD+1, Cmid) scratch: padded stage-1 output
    # col_ref   : (TH*W, 9*Cmid) scratch (only when use_im2col)
    TH, W, Cout = o_ref.shape
    Cin = x_main_ref.shape[-1]
    Cmid = w1_ref.shape[1]
    Wp = h1_ref.shape[1]
    cdt = h1_ref.dtype
    L = _LPAD

    r = pl.program_id(1)
    nr = pl.num_programs(1)

    # Zero ONLY the never-written padding columns (conv2's left/right zero pad).
    # Re-done every step so the scratch state is independent of grid order.
    h1_ref[:, L - 1:L, :] = jnp.zeros((TH + 2, 1, Cmid), cdt)
    h1_ref[:, L + W:L + W + 1, :] = jnp.zeros((TH + 2, 1, Cmid), cdt)

    def stage1(x2d):  # (R, Cin) -> (R, Cmid) = relu(x @ w1 + b1)
        y = jnp.dot(x2d, w1_ref[...], preferred_element_type=jnp.float32)
        return jnp.maximum(y + b1_ref[...], 0.0).astype(cdt)

    # Stage 1 on the tile's interior rows (store starts at the aligned column L).
    h1_ref[1:TH + 1, L:L + W, :] = stage1(
        x_main_ref[...].reshape(TH * W, Cin)).reshape(TH, W, Cmid)

    # Stage 1 on the one-row halos; at the image border the halo row is conv2's
    # zero padding instead.
    @pl.when(r > 0)
    def _():
        h1_ref[0:1, L:L + W, :] = stage1(
            x_top_ref[...].reshape(W, Cin)).reshape(1, W, Cmid)

    @pl.when(r == 0)
    def _():
        h1_ref[0:1, :, :] = jnp.zeros((1, Wp, Cmid), cdt)

    @pl.when(r < nr - 1)
    def _():
        h1_ref[TH + 1:TH + 2, L:L + W, :] = stage1(
            x_bot_ref[...].reshape(W, Cin)).reshape(1, W, Cmid)

    @pl.when(r == nr - 1)
    def _():
        h1_ref[TH + 1:TH + 2, :, :] = jnp.zeros((1, Wp, Cmid), cdt)

    # Stage 2: 3x3 conv.
    def tap(kh, kw):  # stage-1 window for kernel tap (kh, kw)
        c0 = L - 1 + kw
        return h1_ref[kh:kh + TH, c0:c0 + W, :].reshape(TH * W, Cmid)

    if use_im2col:
        # One big-K matmul (K = 9*Cmid); tap slots are 128-lane aligned since
        # Cmid % 128 == 0 on this path.
        col_ref = col_scratch[0]
        for kh in range(3):
            for kw in range(3):
                t = kh * 3 + kw
                col_ref[:, t * Cmid:(t + 1) * Cmid] = tap(kh, kw)
        h2 = jnp.dot(col_ref[...], w2_ref[...],
                     preferred_element_type=jnp.float32)
    else:
        # Narrow-middle path: nine accumulated matmuls straight from h1 slices,
        # no im2col copy traffic.
        h2 = jnp.zeros((TH * W, Cmid), jnp.float32)
        for kh in range(3):
            for kw in range(3):
                t = kh * 3 + kw
                h2 = h2 + jnp.dot(tap(kh, kw),
                                  w2_ref[t * Cmid:(t + 1) * Cmid, :],
                                  preferred_element_type=jnp.float32)
    h2 = jnp.maximum(h2 + b2_ref[...], 0.0).astype(cdt)

    # Stage 3: 1x1 conv + BN + residual add + ReLU.
    y = jnp.dot(h2, w3_ref[...], preferred_element_type=jnp.float32)
    identity = x_main_ref[...].reshape(TH * W, Cout).astype(jnp.float32)
    y = jnp.maximum(y + b3_ref[...] + identity, 0.0)
    o_ref[...] = y.reshape(TH, W, Cout).astype(o_ref.dtype)


# ---------------------------------------------------------------------------
# Wrapper
# ---------------------------------------------------------------------------
def _pick_row_tile(H, W, row_tile, per_row_bytes, fixed_bytes, budget):
    divs = sorted(d for d in range(1, H + 1) if H % d == 0)
    if row_tile is not None:
        th = max([d for d in divs if d <= row_tile] or [divs[0]])
    else:
        th = max([d for d in divs if d <= 8] or [divs[0]])
        if th * W < 256:  # aim for MXU-friendly M = TH*W >= 256
            bigger = [d for d in divs if d * W >= 256]
            if bigger:
                th = min(bigger)
    # Shrink (by divisors) if the per-step footprint would blow the VMEM budget.
    while fixed_bytes + per_row_bytes * (th + 2) > budget:
        smaller = [d for d in divs if d < th]
        if not smaller:
            break
        th = max(smaller)
    return th


def bottleneck_forward(x_nchw, params, *, compute_dtype=jnp.float32,
                       out_dtype=None, row_tile=None):
    x = jnp.transpose(x_nchw, (0, 2, 3, 1))                   # NCHW -> NHWC
    N, H, W, Cin = x.shape
    Cmid = params["w1"].shape[1]
    Cout = params["w3"].shape[1]
    assert Cin == Cout, "downsample=None requires inplanes == planes * 4"

    out_dtype = compute_dtype if out_dtype is None else out_dtype
    cb = jnp.dtype(compute_dtype).itemsize
    ob = jnp.dtype(out_dtype).itemsize
    use_im2col = (Cmid % 128 == 0)

    # Per-generation VMEM capacity (fallback: the smallest, v7x's 64 MiB).
    try:
        vmem_cap = int(getattr(pltpu.get_tpu_info(), "vmem_capacity_bytes",
                               64 * 1024 * 1024))
    except Exception:
        vmem_cap = 64 * 1024 * 1024

    # Footprint model (double-buffered row tiles + resident weights + scratch +
    # f32 temporaries), used both for tile selection and vmem_limit_bytes.
    per_row = (2 * W * Cin * cb                       # x_main (double-buffered)
               + 2 * W * Cout * ob                    # output tile
               + (W + _LPAD + 1) * Cmid * cb          # h1 scratch
               + (9 * W * Cmid * cb if use_im2col else 0)
               + W * (2 * Cmid + Cout) * 4)           # f32 temporaries
    fixed = ((Cin * Cmid + 9 * Cmid * Cmid + Cmid * Cout) * cb
             + (2 * Cmid + Cout) * 4
             + 4 * W * Cin * cb)                      # halo row streams
    th = _pick_row_tile(H, W, row_tile, per_row, fixed, int(0.8 * vmem_cap))
    nr = H // th

    est = fixed + per_row * (th + 2)
    vmem_limit = int(min(int(0.9 * vmem_cap),
                         max(32 * 1024 * 1024, int(1.5 * est))))

    f32 = jnp.float32
    # Fold BN scale into the conv weights (done in f32, then cast once).
    w1f = (params["w1"] * params["s1"]).astype(compute_dtype)
    w2f = (params["w2"] * params["s2"]).reshape(9 * Cmid, Cmid).astype(compute_dtype)
    w3f = (params["w3"] * params["s3"]).astype(compute_dtype)
    b1 = params["b1"].astype(f32)
    b2 = params["b2"].astype(f32)
    b3 = params["b3"].astype(f32)
    xk = x.astype(compute_dtype)

    # Weights / biases: whole-array VMEM residents (not re-pipelined per step).
    vmem_res = pl.BlockSpec(memory_space=pltpu.MemorySpace.VMEM)

    flops = 2 * N * H * W * (Cin * Cmid + 9 * Cmid * Cmid + Cmid * Cout)
    bytes_accessed = (N * H * W * Cin * cb * (th + 2) // th
                      + N * H * W * Cout * ob
                      + (Cin * Cmid + 9 * Cmid * Cmid + Cmid * Cout) * cb)

    scratch = [pltpu.VMEM((th + 2, W + _LPAD + 1, Cmid), compute_dtype)]
    if use_im2col:
        scratch.append(pltpu.VMEM((th * W, 9 * Cmid), compute_dtype))

    kernel = functools.partial(_bottleneck_kernel, use_im2col=use_im2col)

    out = pl.pallas_call(
        kernel,
        out_shape=jax.ShapeDtypeStruct((N, H, W, Cout), out_dtype),
        grid_spec=pltpu.PrefetchScalarGridSpec(
            num_scalar_prefetch=0,
            grid=(N, nr),
            in_specs=[
                # one-row halo above the tile (clamped at the top border; the
                # kernel zeroes that h1 row instead of using it there)
                pl.BlockSpec((None, 1, W, Cin),
                             lambda n, r: (n, jnp.maximum(r * th - 1, 0), 0, 0)),
                # the tile's rows (also the residual input)
                pl.BlockSpec((None, th, W, Cin), lambda n, r: (n, r, 0, 0)),
                # one-row halo below the tile (clamped at the bottom border)
                pl.BlockSpec((None, 1, W, Cin),
                             lambda n, r: (n, jnp.minimum(r * th + th, H - 1), 0, 0)),
                vmem_res, vmem_res, vmem_res, vmem_res, vmem_res, vmem_res,
            ],
            out_specs=pl.BlockSpec((None, th, W, Cout), lambda n, r: (n, r, 0, 0)),
            scratch_shapes=scratch,
        ),
        compiler_params=pltpu.CompilerParams(
            dimension_semantics=("parallel", "parallel"),
            vmem_limit_bytes=vmem_limit,
        ),
        cost_estimate=pl.CostEstimate(flops=int(flops), transcendentals=0,
                                      bytes_accessed=int(bytes_accessed)),
    )(xk, xk, xk, w1f, b1, w2f, b2, w3f, b3)
    return jnp.transpose(out, (0, 3, 1, 2))                   # back to NCHW


# ---------------------------------------------------------------------------
# Parameters (BN folded to per-channel scale/bias, inference mode)
# ---------------------------------------------------------------------------
def _fold_bn(gamma, beta, mean, var, eps=1e-5):
    scale = gamma / jnp.sqrt(var + eps)
    bias = beta - mean * scale
    return scale.reshape(1, -1), bias.reshape(1, -1)


def make_params(inplanes, planes, base_width=64, groups=1, key=None):
    expansion = 4
    width = int(planes * (base_width / 64.0)) * groups
    cout = planes * expansion
    k = jax.random.split(key, 3)
    w1 = jax.random.normal(k[0], (inplanes, width), jnp.float32) * 0.1
    w2 = jax.random.normal(k[1], (3, 3, width, width), jnp.float32) * 0.1
    w3 = jax.random.normal(k[2], (width, cout), jnp.float32) * 0.1

    def bn_params(c, off):
        gamma = 1.0 + 0.01 * (jnp.arange(c, dtype=jnp.float32) + off)
        beta = 0.01 * (jnp.arange(c, dtype=jnp.float32) - off)
        mean = 0.02 * jnp.arange(c, dtype=jnp.float32)
        var = 1.0 + 0.03 * jnp.arange(c, dtype=jnp.float32)
        return _fold_bn(gamma, beta, mean, var)

    s1, b1 = bn_params(width, 0.0)
    s2, b2 = bn_params(width, 1.0)
    s3, b3 = bn_params(cout, 2.0)
    return {"w1": w1, "w2": w2, "w3": w3,
            "s1": s1, "b1": b1, "s2": s2, "b2": b2, "s3": s3, "b3": b3}


# ---------------------------------------------------------------------------
# Pure-JAX reference for validation
# ---------------------------------------------------------------------------
def bottleneck_ref(x_nchw, p):
    x = jnp.transpose(x_nchw, (0, 2, 3, 1))
    N, H, W, _ = x.shape
    identity = x
    y = jnp.einsum("nhwc,cd->nhwd", x, p["w1"])
    y = jnp.maximum(y * p["s1"] + p["b1"], 0.0)
    yp = jnp.pad(y, ((0, 0), (1, 1), (1, 1), (0, 0)))
    y2 = jnp.zeros((N, H, W, p["w2"].shape[-1]), jnp.float32)
    for kh in range(3):
        for kw in range(3):
            y2 = y2 + jnp.einsum("nhwc,cd->nhwd",
                                 yp[:, kh:kh + H, kw:kw + W, :],
                                 p["w2"][kh, kw])
    y2 = jnp.maximum(y2 * p["s2"] + p["b2"], 0.0)
    y3 = jnp.einsum("nhwc,cd->nhwd", y2, p["w3"])
    y3 = jnp.maximum(y3 * p["s3"] + p["b3"] + identity, 0.0)
    return jnp.transpose(y3, (0, 3, 1, 2))


if __name__ == "__main__":
    fwd = jax.jit(bottleneck_forward,
                  static_argnames=("compute_dtype", "out_dtype", "row_tile"))

    key = jax.random.PRNGKey(0)
    kx, kp, kx2, kp2, kx3, kp3 = jax.random.split(key, 6)

    # Config A: small spec-consistent shapes (batch=2, planes=4 -> width=4,
    # out channels=16, spatial 16x16; inplanes == planes*4 since downsample=None).
    N, planes, H, W = 2, 4, 16, 16
    inplanes = planes * 4
    x = jax.random.normal(kx, (N, inplanes, H, W), jnp.float32)   # NCHW
    params = make_params(inplanes, planes, key=kp)
    ref = jax.block_until_ready(bottleneck_ref(x, params))

    out_f32 = jax.block_until_ready(fwd(x, params))
    assert out_f32.shape == (N, planes * 4, H, W), out_f32.shape
    assert jnp.allclose(out_f32, ref, atol=1e-3, rtol=1e-3), "f32 mismatch"

    # Same inputs, forced multi-tile grid (exercises halo rows / border zeroing).
    out_tiled = jax.block_until_ready(fwd(x, params, row_tile=4))
    assert jnp.allclose(out_tiled, ref, atol=1e-3, rtol=1e-3), "halo-tile mismatch"

    # bf16 compute / bf16 HBM output.
    out_bf16 = jax.block_until_ready(
        fwd(x, params, compute_dtype=jnp.bfloat16))
    assert jnp.allclose(out_bf16.astype(jnp.float32), ref,
                        atol=1e-1, rtol=1e-1), "bf16 mismatch"

    # Config B: wider channels (width=32, out=128) with two row tiles.
    N2, planes2, H2, W2 = 1, 32, 16, 16
    inplanes2 = planes2 * 4
    x2 = jax.random.normal(kx2, (N2, inplanes2, H2, W2), jnp.float32)
    params2 = make_params(inplanes2, planes2, key=kp2)
    ref2 = jax.block_until_ready(bottleneck_ref(x2, params2))
    out2 = jax.block_until_ready(fwd(x2, params2, row_tile=8))
    assert jnp.allclose(out2, ref2, atol=1e-3, rtol=1e-3), "wide-channel mismatch"

    # Config C: Cmid=128 -> exercises the big-K im2col path (lane-aligned taps).
    N3, planes3, H3, W3 = 1, 128, 8, 8
    inplanes3 = planes3 * 4
    x3 = jax.random.normal(kx3, (N3, inplanes3, H3, W3), jnp.float32)
    params3 = make_params(inplanes3, planes3, key=kp3)
    ref3 = jax.block_until_ready(bottleneck_ref(x3, params3))
    out3 = jax.block_until_ready(fwd(x3, params3, row_tile=4))
    assert jnp.allclose(out3, ref3, atol=3e-2, rtol=3e-2), "im2col-path mismatch"

    print("KERNEL_OK")
</pallas_src>

<mosaic_0001>
module attributes {stable_mosaic.version = 11 : i64} {
  func.func @_bottleneck_kernel(%arg0: i32, %arg1: i32, %arg2: memref<1x1x16x16xf32, #tpu.memory_space<vmem>>, %arg3: memref<1x16x16x16xf32, #tpu.memory_space<vmem>>, %arg4: memref<1x1x16x16xf32, #tpu.memory_space<vmem>>, %arg5: memref<16x4xf32, #tpu.memory_space<vmem>>, %arg6: memref<1x4xf32, #tpu.memory_space<vmem>>, %arg7: memref<36x4xf32, #tpu.memory_space<vmem>>, %arg8: memref<1x4xf32, #tpu.memory_space<vmem>>, %arg9: memref<4x16xf32, #tpu.memory_space<vmem>>, %arg10: memref<1x16xf32, #tpu.memory_space<vmem>>, %arg11: memref<1x16x16x16xf32, #tpu.memory_space<vmem>>, %arg12: memref<18x25x4xf32, #tpu.memory_space<vmem>>) attributes {dimension_semantics = [#tpu.dimension_semantics<parallel>, #tpu.dimension_semantics<parallel>], iteration_bounds = array<i64: 2, 1>, scalar_prefetch = 0 : i64, scratch_operands = 1 : i64, tpu.core_type = #tpu.core_type<tc>, window_params = [{transform_indices = @transform_0, window_bounds = array<i64: 1, 1, 16, 16>}, {transform_indices = @transform_1, window_bounds = array<i64: 1, 16, 16, 16>}, {transform_indices = @transform_2, window_bounds = array<i64: 1, 1, 16, 16>}, {pipeline_mode = #tpu.pipeline_mode<synchronous>, transform_indices = @transform_3, window_bounds = array<i64: 16, 4>}, {pipeline_mode = #tpu.pipeline_mode<synchronous>, transform_indices = @transform_4, window_bounds = array<i64: 1, 4>}, {pipeline_mode = #tpu.pipeline_mode<synchronous>, transform_indices = @transform_5, window_bounds = array<i64: 36, 4>}, {pipeline_mode = #tpu.pipeline_mode<synchronous>, transform_indices = @transform_6, window_bounds = array<i64: 1, 4>}, {pipeline_mode = #tpu.pipeline_mode<synchronous>, transform_indices = @transform_7, window_bounds = array<i64: 4, 16>}, {pipeline_mode = #tpu.pipeline_mode<synchronous>, transform_indices = @transform_8, window_bounds = array<i64: 1, 16>}, {transform_indices = @transform_9, window_bounds = array<i64: 1, 16, 16, 16>}]} {
    %cst = arith.constant 0.000000e+00 : f32
    %0 = vector.broadcast %cst : f32 to vector<18x1x4xf32>
    %c0 = arith.constant 0 : index
    %c7 = arith.constant 7 : index
    %c0_0 = arith.constant 0 : index
    %1 = vector.load %arg12[%c0, %c7, %c0_0] : memref<18x25x4xf32, #tpu.memory_space<vmem>>, vector<18x1x4xf32>
    tpu.vector_store %arg12[%c0, %c7, %c0_0], %0 {strides = array<i32>} : memref<18x25x4xf32, #tpu.memory_space<vmem>>, vector<18x1x4xf32>,
    %cst_1 = arith.constant 0.000000e+00 : f32
    %2 = vector.broadcast %cst_1 : f32 to vector<18x1x4xf32>
    %c0_2 = arith.constant 0 : index
    %c24 = arith.constant 24 : index
    %c0_3 = arith.constant 0 : index
    %3 = vector.load %arg12[%c0_2, %c24, %c0_3] : memref<18x25x4xf32, #tpu.memory_space<vmem>>, vector<18x1x4xf32>
    tpu.vector_store %arg12[%c0_2, %c24, %c0_3], %2 {strides = array<i32>} : memref<18x25x4xf32, #tpu.memory_space<vmem>>, vector<18x1x4xf32>,
    %c0_4 = arith.constant 0 : index
    %c0_5 = arith.constant 0 : index
    %c0_6 = arith.constant 0 : index
    %c0_7 = arith.constant 0 : index
    %4 = vector.load %arg3[%c0_4, %c0_5, %c0_6, %c0_7] : memref<1x16x16x16xf32, #tpu.memory_space<vmem>>, vector<1x16x16x16xf32>
    %5 = vector.shape_cast %4 : vector<1x16x16x16xf32> to vector<16x16x16xf32>
    %6 = vector.shape_cast %5 : vector<16x16x16xf32> to vector<256x16xf32>
    %c0_8 = arith.constant 0 : index
    %c0_9 = arith.constant 0 : index
    %7 = vector.load %arg5[%c0_8, %c0_9] : memref<16x4xf32, #tpu.memory_space<vmem>>, vector<16x4xf32>
    %cst_10 = arith.constant dense<0.000000e+00> : vector<256x4xf32>
    %8 = tpu.matmul %6, %7, %cst_10 {dimension_numbers = #tpu.dot_dimension_numbers<[1], [0], [0], [1], [0, 0, 1, 1], [], []>} : vector<256x16xf32>, vector<16x4xf32>, vector<256x4xf32> -> vector<256x4xf32>
    %c0_11 = arith.constant 0 : index
    %c0_12 = arith.constant 0 : index
    %9 = vector.load %arg6[%c0_11, %c0_12] : memref<1x4xf32, #tpu.memory_space<vmem>>, vector<1x4xf32>
    %10 = vector.broadcast %9 : vector<1x4xf32> to vector<256x4xf32>
    %11 = arith.addf %8, %10 : vector<256x4xf32>
    %cst_13 = arith.constant 0.000000e+00 : f32
    %12 = vector.broadcast %cst_13 : f32 to vector<256x4xf32>
    %13 = arith.maximumf %11, %12 : vector<256x4xf32>
    %14 = vector.shape_cast %13 : vector<256x4xf32> to vector<16x16x4xf32>
    %c1 = arith.constant 1 : index
    %c8 = arith.constant 8 : index
    %c0_14 = arith.constant 0 : index
    %15 = vector.load %arg12[%c1, %c8, %c0_14] : memref<18x25x4xf32, #tpu.memory_space<vmem>>, vector<16x16x4xf32>
    tpu.vector_store %arg12[%c1, %c8, %c0_14], %14 {strides = array<i32>} : memref<18x25x4xf32, #tpu.memory_space<vmem>>, vector<16x16x4xf32>,
    %c0_i32 = arith.constant 0 : i32
    %16 = arith.cmpi sgt, %arg1, %c0_i32 : i32
    %17 = arith.extui %16 : i1 to i32
    %c0_i32_15 = arith.constant 0 : i32
    %18 = arith.cmpi ne, %17, %c0_i32_15 : i32
    scf.if %18 {
      %c0_86 = arith.constant 0 : index
      %c0_87 = arith.constant 0 : index
      %c0_88 = arith.constant 0 : index
      %c0_89 = arith.constant 0 : index
      %94 = vector.load %arg2[%c0_86, %c0_87, %c0_88, %c0_89] : memref<1x1x16x16xf32, #tpu.memory_space<vmem>>, vector<1x1x16x16xf32>
      %95 = vector.shape_cast %94 : vector<1x1x16x16xf32> to vector<1x16x16xf32>
      %96 = vector.shape_cast %95 : vector<1x16x16xf32> to vector<16x16xf32>
      %c0_90 = arith.constant 0 : index
      %c0_91 = arith.constant 0 : index
      %97 = vector.load %arg5[%c0_90, %c0_91] : memref<16x4xf32, #tpu.memory_space<vmem>>, vector<16x4xf32>
      %cst_92 = arith.constant dense<0.000000e+00> : vector<16x4xf32>
      %98 = tpu.matmul %96, %97, %cst_92 {dimension_numbers = #tpu.dot_dimension_numbers<[1], [0], [0], [1], [0, 0, 1, 1], [], []>} : vector<16x16xf32>, vector<16x4xf32>, vector<16x4xf32> -> vector<16x4xf32>
      %c0_93 = arith.constant 0 : index
      %c0_94 = arith.constant 0 : index
      %99 = vector.load %arg6[%c0_93, %c0_94] : memref<1x4xf32, #tpu.memory_space<vmem>>, vector<1x4xf32>
      %100 = vector.broadcast %99 : vector<1x4xf32> to vector<16x4xf32>
      %101 = arith.addf %98, %100 : vector<16x4xf32>
      %cst_95 = arith.constant 0.000000e+00 : f32
      %102 = vector.broadcast %cst_95 : f32 to vector<16x4xf32>
      %103 = arith.maximumf %101, %102 : vector<16x4xf32>
      %104 = vector.shape_cast %103 : vector<16x4xf32> to vector<1x16x4xf32>
      %c0_96 = arith.constant 0 : index
      %c8_97 = arith.constant 8 : index
      %c0_98 = arith.constant 0 : index
      %105 = vector.load %arg12[%c0_96, %c8_97, %c0_98] : memref<18x25x4xf32, #tpu.memory_space<vmem>>, vector<1x16x4xf32>
      tpu.vector_store %arg12[%c0_96, %c8_97, %c0_98], %104 {strides = array<i32>} : memref<18x25x4xf32, #tpu.memory_space<vmem>>, vector<1x16x4xf32>,
    } else {
    }
    %c0_i32_16 = arith.constant 0 : i32
    %19 = arith.cmpi eq, %arg1, %c0_i32_16 : i32
    %20 = arith.extui %19 : i1 to i32
    %c0_i32_17 = arith.constant 0 : i32
    %21 = arith.cmpi ne, %20, %c0_i32_17 : i32
    scf.if %21 {
      %cst_86 = arith.constant 0.000000e+00 : f32
      %94 = vector.broadcast %cst_86 : f32 to vector<1x25x4xf32>
      %c0_87 = arith.constant 0 : index
      %c0_88 = arith.constant 0 : index
      %c0_89 = arith.constant 0 : index
      %95 = vector.load %arg12[%c0_87, %c0_88, %c0_89] : memref<18x25x4xf32, #tpu.memory_space<vmem>>, vector<1x25x4xf32>
      tpu.vector_store %arg12[%c0_87, %c0_88, %c0_89], %94 {strides = array<i32>} : memref<18x25x4xf32, #tpu.memory_space<vmem>>, vector<1x25x4xf32>,
    } else {
    }
    %c0_i32_18 = arith.constant 0 : i32
    %22 = arith.cmpi slt, %arg1, %c0_i32_18 : i32
    %23 = arith.extui %22 : i1 to i32
    %c0_i32_19 = arith.constant 0 : i32
    %24 = arith.cmpi ne, %23, %c0_i32_19 : i32
    scf.if %24 {
      %c0_86 = arith.constant 0 : index
      %c0_87 = arith.constant 0 : index
      %c0_88 = arith.constant 0 : index
      %c0_89 = arith.constant 0 : index
      %94 = vector.load %arg4[%c0_86, %c0_87, %c0_88, %c0_89] : memref<1x1x16x16xf32, #tpu.memory_space<vmem>>, vector<1x1x16x16xf32>
      %95 = vector.shape_cast %94 : vector<1x1x16x16xf32> to vector<1x16x16xf32>
      %96 = vector.shape_cast %95 : vector<1x16x16xf32> to vector<16x16xf32>
      %c0_90 = arith.constant 0 : index
      %c0_91 = arith.constant 0 : index
      %97 = vector.load %arg5[%c0_90, %c0_91] : memref<16x4xf32, #tpu.memory_space<vmem>>, vector<16x4xf32>
      %cst_92 = arith.constant dense<0.000000e+00> : vector<16x4xf32>
      %98 = tpu.matmul %96, %97, %cst_92 {dimension_numbers = #tpu.dot_dimension_numbers<[1], [0], [0], [1], [0, 0, 1, 1], [], []>} : vector<16x16xf32>, vector<16x4xf32>, vector<16x4xf32> -> vector<16x4xf32>
      %c0_93 = arith.constant 0 : index
      %c0_94 = arith.constant 0 : index
      %99 = vector.load %arg6[%c0_93, %c0_94] : memref<1x4xf32, #tpu.memory_space<vmem>>, vector<1x4xf32>
      %100 = vector.broadcast %99 : vector<1x4xf32> to vector<16x4xf32>
      %101 = arith.addf %98, %100 : vector<16x4xf32>
      %cst_95 = arith.constant 0.000000e+00 : f32
      %102 = vector.broadcast %cst_95 : f32 to vector<16x4xf32>
      %103 = arith.maximumf %101, %102 : vector<16x4xf32>
      %104 = vector.shape_cast %103 : vector<16x4xf32> to vector<1x16x4xf32>
      %c17 = arith.constant 17 : index
      %c8_96 = arith.constant 8 : index
      %c0_97 = arith.constant 0 : index
      %105 = vector.load %arg12[%c17, %c8_96, %c0_97] : memref<18x25x4xf32, #tpu.memory_space<vmem>>, vector<1x16x4xf32>
      tpu.vector_store %arg12[%c17, %c8_96, %c0_97], %104 {strides = array<i32>} : memref<18x25x4xf32, #tpu.memory_space<vmem>>, vector<1x16x4xf32>,
    } else {
    }
    %c0_i32_20 = arith.constant 0 : i32
    %25 = arith.cmpi eq, %arg1, %c0_i32_20 : i32
    %26 = arith.extui %25 : i1 to i32
    %c0_i32_21 = arith.constant 0 : i32
    %27 = arith.cmpi ne, %26, %c0_i32_21 : i32
    scf.if %27 {
      %cst_86 = arith.constant 0.000000e+00 : f32
      %94 = vector.broadcast %cst_86 : f32 to vector<1x25x4xf32>
      %c17 = arith.constant 17 : index
      %c0_87 = arith.constant 0 : index
      %c0_88 = arith.constant 0 : index
      %95 = vector.load %arg12[%c17, %c0_87, %c0_88] : memref<18x25x4xf32, #tpu.memory_space<vmem>>, vector<1x25x4xf32>
      tpu.vector_store %arg12[%c17, %c0_87, %c0_88], %94 {strides = array<i32>} : memref<18x25x4xf32, #tpu.memory_space<vmem>>, vector<1x25x4xf32>,
    } else {
    }
    %cst_22 = arith.constant 0.000000e+00 : f32
    %28 = vector.broadcast %cst_22 : f32 to vector<256x4xf32>
    %c0_23 = arith.constant 0 : index
    %c7_24 = arith.constant 7 : index
    %c0_25 = arith.constant 0 : index
    %29 = vector.load %arg12[%c0_23, %c7_24, %c0_25] : memref<18x25x4xf32, #tpu.memory_space<vmem>>, vector<16x16x4xf32>
    %30 = vector.shape_cast %29 : vector<16x16x4xf32> to vector<256x4xf32>
    %c0_26 = arith.constant 0 : index
    %c0_27 = arith.constant 0 : index
    %31 = vector.load %arg7[%c0_26, %c0_27] : memref<36x4xf32, #tpu.memory_space<vmem>>, vector<4x4xf32>
    %cst_28 = arith.constant dense<0.000000e+00> : vector<256x4xf32>
    %32 = tpu.matmul %30, %31, %cst_28 {dimension_numbers = #tpu.dot_dimension_numbers<[1], [0], [0], [1], [0, 0, 1, 1], [], []>} : vector<256x4xf32>, vector<4x4xf32>, vector<256x4xf32> -> vector<256x4xf32>
    %33 = arith.addf %28, %32 : vector<256x4xf32>
    %c0_29 = arith.constant 0 : index
    %c8_30 = arith.constant 8 : index
    %c0_31 = arith.constant 0 : index
    %34 = vector.load %arg12[%c0_29, %c8_30, %c0_31] : memref<18x25x4xf32, #tpu.memory_space<vmem>>, vector<16x16x4xf32>
    %35 = vector.shape_cast %34 : vector<16x16x4xf32> to vector<256x4xf32>
    %c4 = arith.constant 4 : index
    %c0_32 = arith.constant 0 : index
    %36 = vector.load %arg7[%c4, %c0_32] : memref<36x4xf32, #tpu.memory_space<vmem>>, vector<4x4xf32>
    %cst_33 = arith.constant dense<0.000000e+00> : vector<256x4xf32>
    %37 = tpu.matmul %35, %36, %cst_33 {dimension_numbers = #tpu.dot_dimension_numbers<[1], [0], [0], [1], [0, 0, 1, 1], [], []>} : vector<256x4xf32>, vector<4x4xf32>, vector<256x4xf32> -> vector<256x4xf32>
    %38 = arith.addf %33, %37 : vector<256x4xf32>
    %c0_34 = arith.constant 0 : index
    %c9 = arith.constant 9 : index
    %c0_35 = arith.constant 0 : index
    %39 = vector.load %arg12[%c0_34, %c9, %c0_35] : memref<18x25x4xf32, #tpu.memory_space<vmem>>, vector<16x16x4xf32>
    %40 = vector.shape_cast %39 : vector<16x16x4xf32> to vector<256x4xf32>
    %c8_36 = arith.constant 8 : index
    %c0_37 = arith.constant 0 : index
    %41 = vector.load %arg7[%c8_36, %c0_37] : memref<36x4xf32, #tpu.memory_space<vmem>>, vector<4x4xf32>
    %cst_38 = arith.constant dense<0.000000e+00> : vector<256x4xf32>
    %42 = tpu.matmul %40, %41, %cst_38 {dimension_numbers = #tpu.dot_dimension_numbers<[1], [0], [0], [1], [0, 0, 1, 1], [], []>} : vector<256x4xf32>, vector<4x4xf32>, vector<256x4xf32> -> vector<256x4xf32>
    %43 = arith.addf %38, %42 : vector<256x4xf32>
    %c1_39 = arith.constant 1 : index
    %c7_40 = arith.constant 7 : index
    %c0_41 = arith.constant 0 : index
    %44 = vector.load %arg12[%c1_39, %c7_40, %c0_41] : memref<18x25x4xf32, #tpu.memory_space<vmem>>, vector<16x16x4xf32>
    %45 = vector.shape_cast %44 : vector<16x16x4xf32> to vector<256x4xf32>
    %c12 = arith.constant 12 : index
    %c0_42 = arith.constant 0 : index
    %46 = vector.load %arg7[%c12, %c0_42] : memref<36x4xf32, #tpu.memory_space<vmem>>, vector<4x4xf32>
    %cst_43 = arith.constant dense<0.000000e+00> : vector<256x4xf32>
    %47 = tpu.matmul %45, %46, %cst_43 {dimension_numbers = #tpu.dot_dimension_numbers<[1], [0], [0], [1], [0, 0, 1, 1], [], []>} : vector<256x4xf32>, vector<4x4xf32>, vector<256x4xf32> -> vector<256x4xf32>
    %48 = arith.addf %43, %47 : vector<256x4xf32>
    %c1_44 = arith.constant 1 : index
    %c8_45 = arith.constant 8 : index
    %c0_46 = arith.constant 0 : index
    %49 = vector.load %arg12[%c1_44, %c8_45, %c0_46] : memref<18x25x4xf32, #tpu.memory_space<vmem>>, vector<16x16x4xf32>
    %50 = vector.shape_cast %49 : vector<16x16x4xf32> to vector<256x4xf32>
    %c16 = arith.constant 16 : index
    %c0_47 = arith.constant 0 : index
    %51 = vector.load %arg7[%c16, %c0_47] : memref<36x4xf32, #tpu.memory_space<vmem>>, vector<4x4xf32>
    %cst_48 = arith.constant dense<0.000000e+00> : vector<256x4xf32>
    %52 = tpu.matmul %50, %51, %cst_48 {dimension_numbers = #tpu.dot_dimension_numbers<[1], [0], [0], [1], [0, 0, 1, 1], [], []>} : vector<256x4xf32>, vector<4x4xf32>, vector<256x4xf32> -> vector<256x4xf32>
    %53 = arith.addf %48, %52 : vector<256x4xf32>
    %c1_49 = arith.constant 1 : index
    %c9_50 = arith.constant 9 : index
    %c0_51 = arith.constant 0 : index
    %54 = vector.load %arg12[%c1_49, %c9_50, %c0_51] : memref<18x25x4xf32, #tpu.memory_space<vmem>>, vector<16x16x4xf32>
    %55 = vector.shape_cast %54 : vector<16x16x4xf32> to vector<256x4xf32>
    %c20 = arith.constant 20 : index
    %c0_52 = arith.constant 0 : index
    %56 = vector.load %arg7[%c20, %c0_52] : memref<36x4xf32, #tpu.memory_space<vmem>>, vector<4x4xf32>
    %cst_53 = arith.constant dense<0.000000e+00> : vector<256x4xf32>
    %57 = tpu.matmul %55, %56, %cst_53 {dimension_numbers = #tpu.dot_dimension_numbers<[1], [0], [0], [1], [0, 0, 1, 1], [], []>} : vector<256x4xf32>, vector<4x4xf32>, vector<256x4xf32> -> vector<256x4xf32>
    %58 = arith.addf %53, %57 : vector<256x4xf32>
    %c2 = arith.constant 2 : index
    %c7_54 = arith.constant 7 : index
    %c0_55 = arith.constant 0 : index
    %59 = vector.load %arg12[%c2, %c7_54, %c0_55] : memref<18x25x4xf32, #tpu.memory_space<vmem>>, vector<16x16x4xf32>
    %60 = vector.shape_cast %59 : vector<16x16x4xf32> to vector<256x4xf32>
    %c24_56 = arith.constant 24 : index
    %c0_57 = arith.constant 0 : index
    %61 = vector.load %arg7[%c24_56, %c0_57] : memref<36x4xf32, #tpu.memory_space<vmem>>, vector<4x4xf32>
    %cst_58 = arith.constant dense<0.000000e+00> : vector<256x4xf32>
    %62 = tpu.matmul %60, %61, %cst_58 {dimension_numbers = #tpu.dot_dimension_numbers<[1], [0], [0], [1], [0, 0, 1, 1], [], []>} : vector<256x4xf32>, vector<4x4xf32>, vector<256x4xf32> -> vector<256x4xf32>
    %63 = arith.addf %58, %62 : vector<256x4xf32>
    %c2_59 = arith.constant 2 : index
    %c8_60 = arith.constant 8 : index
    %c0_61 = arith.constant 0 : index
    %64 = vector.load %arg12[%c2_59, %c8_60, %c0_61] : memref<18x25x4xf32, #tpu.memory_space<vmem>>, vector<16x16x4xf32>
    %65 = vector.shape_cast %64 : vector<16x16x4xf32> to vector<256x4xf32>
    %c28 = arith.constant 28 : index
    %c0_62 = arith.constant 0 : index
    %66 = vector.load %arg7[%c28, %c0_62] : memref<36x4xf32, #tpu.memory_space<vmem>>, vector<4x4xf32>
    %cst_63 = arith.constant dense<0.000000e+00> : vector<256x4xf32>
    %67 = tpu.matmul %65, %66, %cst_63 {dimension_numbers = #tpu.dot_dimension_numbers<[1], [0], [0], [1], [0, 0, 1, 1], [], []>} : vector<256x4xf32>, vector<4x4xf32>, vector<256x4xf32> -> vector<256x4xf32>
    %68 = arith.addf %63, %67 : vector<256x4xf32>
    %c2_64 = arith.constant 2 : index
    %c9_65 = arith.constant 9 : index
    %c0_66 = arith.constant 0 : index
    %69 = vector.load %arg12[%c2_64, %c9_65, %c0_66] : memref<18x25x4xf32, #tpu.memory_space<vmem>>, vector<16x16x4xf32>
    %70 = vector.shape_cast %69 : vector<16x16x4xf32> to vector<256x4xf32>
    %c32 = arith.constant 32 : index
    %c0_67 = arith.constant 0 : index
    %71 = vector.load %arg7[%c32, %c0_67] : memref<36x4xf32, #tpu.memory_space<vmem>>, vector<4x4xf32>
    %cst_68 = arith.constant dense<0.000000e+00> : vector<256x4xf32>
    %72 = tpu.matmul %70, %71, %cst_68 {dimension_numbers = #tpu.dot_dimension_numbers<[1], [0], [0], [1], [0, 0, 1, 1], [], []>} : vector<256x4xf32>, vector<4x4xf32>, vector<256x4xf32> -> vector<256x4xf32>
    %73 = arith.addf %68, %72 : vector<256x4xf32>
    %c0_69 = arith.constant 0 : index
    %c0_70 = arith.constant 0 : index
    %74 = vector.load %arg8[%c0_69, %c0_70] : memref<1x4xf32, #tpu.memory_space<vmem>>, vector<1x4xf32>
    %75 = vector.broadcast %74 : vector<1x4xf32> to vector<256x4xf32>
    %76 = arith.addf %73, %75 : vector<256x4xf32>
    %cst_71 = arith.constant 0.000000e+00 : f32
    %77 = vector.broadcast %cst_71 : f32 to vector<256x4xf32>
    %78 = arith.maximumf %76, %77 : vector<256x4xf32>
    %c0_72 = arith.constant 0 : index
    %c0_73 = arith.constant 0 : index
    %79 = vector.load %arg9[%c0_72, %c0_73] : memref<4x16xf32, #tpu.memory_space<vmem>>, vector<4x16xf32>
    %cst_74 = arith.constant dense<0.000000e+00> : vector<256x16xf32>
    %80 = tpu.matmul %78, %79, %cst_74 {dimension_numbers = #tpu.dot_dimension_numbers<[1], [0], [0], [1], [0, 0, 1, 1], [], []>} : vector<256x4xf32>, vector<4x16xf32>, vector<256x16xf32> -> vector<256x16xf32>
    %c0_75 = arith.constant 0 : index
    %c0_76 = arith.constant 0 : index
    %c0_77 = arith.constant 0 : index
    %c0_78 = arith.constant 0 : index
    %81 = vector.load %arg3[%c0_75, %c0_76, %c0_77, %c0_78] : memref<1x16x16x16xf32, #tpu.memory_space<vmem>>, vector<1x16x16x16xf32>
    %82 = vector.shape_cast %81 : vector<1x16x16x16xf32> to vector<16x16x16xf32>
    %83 = vector.shape_cast %82 : vector<16x16x16xf32> to vector<256x16xf32>
    %c0_79 = arith.constant 0 : index
    %c0_80 = arith.constant 0 : index
    %84 = vector.load %arg10[%c0_79, %c0_80] : memref<1x16xf32, #tpu.memory_space<vmem>>, vector<1x16xf32>
    %85 = vector.broadcast %84 : vector<1x16xf32> to vector<256x16xf32>
    %86 = arith.addf %80, %85 : vector<256x16xf32>
    %87 = arith.addf %86, %83 : vector<256x16xf32>
    %cst_81 = arith.constant 0.000000e+00 : f32
    %88 = vector.broadcast %cst_81 : f32 to vector<256x16xf32>
    %89 = arith.maximumf %87, %88 : vector<256x16xf32>
    %90 = vector.shape_cast %89 : vector<256x16xf32> to vector<16x16x16xf32>
    %c0_82 = arith.constant 0 : index
    %c0_83 = arith.constant 0 : index
    %c0_84 = arith.constant 0 : index
    %c0_85 = arith.constant 0 : index
    %91 = vector.load %arg11[%c0_82, %c0_83, %c0_84, %c0_85] : memref<1x16x16x16xf32, #tpu.memory_space<vmem>>, vector<1x16x16x16xf32>
    %92 = vector.shape_cast %91 : vector<1x16x16x16xf32> to vector<16x16x16xf32>
    %93 = vector.shape_cast %90 : vector<16x16x16xf32> to vector<1x16x16x16xf32>
    tpu.vector_store %arg11[%c0_82, %c0_83, %c0_84, %c0_85], %93 {strides = array<i32>} : memref<1x16x16x16xf32, #tpu.memory_space<vmem>>, vector<1x16x16x16xf32>,
    return
  }
  func.func @transform_0(%arg0: i32, %arg1: i32) -> (i32, i32, i32, i32) {
    %c16_i32 = arith.constant 16 : i32
    %0 = arith.muli %arg1, %c16_i32 : i32
    %c1_i32 = arith.constant 1 : i32
    %1 = arith.subi %0, %c1_i32 : i32
    %c0_i32 = arith.constant 0 : i32
    %2 = arith.maxsi %1, %c0_i32 : i32
    %c0_i32_0 = arith.constant 0 : i32
    %c0_i32_1 = arith.constant 0 : i32
    %c0_i32_2 = arith.constant 0 : i32
    return %arg0, %2, %c0_i32_0, %c0_i32_1 : i32, i32, i32, i32
  }
  func.func @transform_1(%arg0: i32, %arg1: i32) -> (i32, i32, i32, i32) {
    %c0_i32 = arith.constant 0 : i32
    %c0_i32_0 = arith.constant 0 : i32
    %c0_i32_1 = arith.constant 0 : i32
    return %arg0, %arg1, %c0_i32, %c0_i32_0 : i32, i32, i32, i32
  }
  func.func @transform_2(%arg0: i32, %arg1: i32) -> (i32, i32, i32, i32) {
    %c16_i32 = arith.constant 16 : i32
    %0 = arith.muli %arg1, %c16_i32 : i32
    %c16_i32_0 = arith.constant 16 : i32
    %1 = arith.addi %0, %c16_i32_0 : i32
    %c15_i32 = arith.constant 15 : i32
    %2 = arith.minsi %1, %c15_i32 : i32
    %c0_i32 = arith.constant 0 : i32
    %c0_i32_1 = arith.constant 0 : i32
    %c0_i32_2 = arith.constant 0 : i32
    return %arg0, %2, %c0_i32, %c0_i32_1 : i32, i32, i32, i32
  }
  func.func @transform_3(%arg0: i32, %arg1: i32) -> (i32, i32) {
    %c0_i32 = arith.constant 0 : i32
    %c0_i32_0 = arith.constant 0 : i32
    %c0_i32_1 = arith.constant 0 : i32
    return %c0_i32, %c0_i32_0 : i32, i32
  }
  func.func @transform_4(%arg0: i32, %arg1: i32) -> (i32, i32) {
    %c0_i32 = arith.constant 0 : i32
    %c0_i32_0 = arith.constant 0 : i32
    %c0_i32_1 = arith.constant 0 : i32
    return %c0_i32, %c0_i32_0 : i32, i32
  }
  func.func @transform_5(%arg0: i32, %arg1: i32) -> (i32, i32) {
    %c0_i32 = arith.constant 0 : i32
    %c0_i32_0 = arith.constant 0 : i32
    %c0_i32_1 = arith.constant 0 : i32
    return %c0_i32, %c0_i32_0 : i32, i32
  }
  func.func @transform_6(%arg0: i32, %arg1: i32) -> (i32, i32) {
    %c0_i32 = arith.constant 0 : i32
    %c0_i32_0 = arith.constant 0 : i32
    %c0_i32_1 = arith.constant 0 : i32
    return %c0_i32, %c0_i32_0 : i32, i32
  }
  func.func @transform_7(%arg0: i32, %arg1: i32) -> (i32, i32) {
    %c0_i32 = arith.constant 0 : i32
    %c0_i32_0 = arith.constant 0 : i32
    %c0_i32_1 = arith.constant 0 : i32
    return %c0_i32, %c0_i32_0 : i32, i32
  }
  func.func @transform_8(%arg0: i32, %arg1: i32) -> (i32, i32) {
    %c0_i32 = arith.constant 0 : i32
    %c0_i32_0 = arith.constant 0 : i32
    %c0_i32_1 = arith.constant 0 : i32
    return %c0_i32, %c0_i32_0 : i32, i32
  }
  func.func @transform_9(%arg0: i32, %arg1: i32) -> (i32, i32, i32, i32) {
    %c0_i32 = arith.constant 0 : i32
    %c0_i32_0 = arith.constant 0 : i32
    %c0_i32_1 = arith.constant 0 : i32
    return %arg0, %arg1, %c0_i32, %c0_i32_0 : i32, i32, i32, i32
  }
}

</mosaic_0001>

<bundles_post_ra>
// kernel: bottleneck_forward.1
= control target key start
LH: loop header
LB: loop body
LE: loop exit
PB: predicated region body
PF: predicated region fallthrough
CT: control target
= control target key end

     0   :  { %s6961_s28 = smov 0   ;;  %s6963_s29 = smov 0   ;;  %s8257_s0 = inlined_call_operand.vmem [shape: f32[2,16,16,16], index: 0, kind: input, shape index: {}, may-alias: {0,1,2}]   ;;  %s8258_s1 = inlined_call_operand.vmem [shape: f32[2,16,16,16], index: 1, kind: input, shape index: {}, may-alias: {0,1,2}]   ;;  %s8259_s2 = inlined_call_operand.vmem [shape: f32[2,16,16,16], index: 2, kind: input, shape index: {}, may-alias: {0,1,2}]   ;;  %s8260_s3 = inlined_call_operand.vmem [shape: f32[16,4], index: 3, kind: input, shape index: {}]   ;;  %s8261_s4 = inlined_call_operand.vmem [shape: f32[1,4], index: 4, kind: input, shape index: {}]   ;;  %s8262_s5 = inlined_call_operand.vmem [shape: f32[36,4], index: 5, kind: input, shape index: {}]   ;;  %s8263_s6 = inlined_call_operand.vmem [shape: f32[1,4], index: 6, kind: input, shape index: {}]   ;;  %s8264_s7 = inlined_call_operand.vmem [shape: f32[4,16], index: 7, kind: input, shape index: {}]   ;;  %s8265_s8 = inlined_call_operand.vmem [shape: f32[1,16], index: 8, kind: input, shape index: {}]   ;;  %s8266_s9 = inlined_call_operand.vmem [shape: f32[2,16,16,16], index: 9, kind: output, shape index: {}]  }
   0x1   :  { %s6965_s30 = smov 0  }
   0x2 LB: > { %s31_s10 = sadd.s32 1, %s6904_s29  ;;  %p5296_p0 = scmp.ge.s32.totalorder %s6908_s30, 1  ;;  %s6908_s30 = sphi %s6965_s30, %s19_s30   ;;  %s6904_s29 = sphi %s6963_s29, %s8316_s29   ;;  %s6900_s28 = sphi %s6961_s28, %s8315_s28  }
   0x3   : > { %p33_p1 = scmp.ge.s32.totalorder %s31_s10, 2  ;;  %p373_p2 = scmp.lt.s32.totalorder %s6908_s30, 3 }
   0x5   : > { %s8318_s10 = smov (%p33_p1, %s31_s10), 0  ;;  %p374_p3 = pnand %p5296_p0, %p373_p2 }
   0x7   : > { %377 = sbr.rel (%p374_p3) target bundleno = 1068 (0x42c), region = 56 }
   0xe   : > { %v570_v0 = vld [vmem:[%s8260_s3] sm:$0xff]  ;;  %v571_v1 = vld [vmem:[%s8260_s3 + $0x8] sm:$0xff]  ;;  %p463_p4 = scmp.lt.s32.totalorder %s6900_s28, 1  ;;  %vm579_vm0 = vcmask 130048   ;;  %vm934_vm1 = vcmask 31744   ;;  %v6910_v35 = vmov 0.0  }
   0xf   : > { %v6599_v2 = vpack.c.bf16 %v571_v1, %v570_v0  ;;  %1072 = vst.msk [vmem:[#allocation2 + $0x8] sm:$0xff] %vm934_vm1, %v6910_v35  ;;  %1073 = vst.msk [vmem:[#allocation2 + $0x10] sm:$0xff] %vm934_vm1, %v6910_v35  ;;  %vm501_vm2 = vcmask 24576   ;;  %v1249_v36 = vld [vmem:[%s8262_s5 + $0x4] sm:$0xf]  ;;  %vm1346_vm3 = vcmask 1043456  }
  0x10   : > { %s8320_s28 = smov (!%p463_p4, %s6900_s28), 1  ;;  %1181 = vst.msk [vmem:[#allocation2 + $0x228] sm:$0xff] %vm934_vm1, %v6910_v35  ;;  %1182 = vst.msk [vmem:[#allocation2 + $0x230] sm:$0xff] %vm934_vm1, %v6910_v35  ;;  %v7113_v39 = vld [vmem:[%s8262_s5 + $0xc] sm:$0xf] }
  0x11   : > { %6600 = vmatprep.subr.bf16.mxu0 %v6599_v2  ;;  %s5679_s15 = sshll.u32 %s8320_s28, 8  ;;  %510 = vst.msk [vmem:[#allocation2 + $0x107] sm:$0x1] %vm501_vm2, %v6910_v35  ;;  %502 = vst.msk [vmem:[#allocation2 + $0x7] sm:$0x1] %vm501_vm2, %v6910_v35  ;;  %6603 = vmatprep.subr.msk.mxu1 %vm1346_vm3, %v7113_v39 }
  0x12   : > { %6602 = vmatpush3.bf16.msra.mxu0 %v6599_v2  ;;  %s6993_s18 = scalar_lea.vmem %s8258_s1, %s5679_s15  ;;  %503 = vst.msk [vmem:[#allocation2 + $0x27] sm:$0x1] %vm501_vm2, %v6910_v35  ;;  %504 = vst.msk [vmem:[#allocation2 + $0x47] sm:$0x1] %vm501_vm2, %v6910_v35  ;;  %6604 = vmatpush3.msk.msra.mxu1 %vm1346_vm3, %v7113_v39  ;;  %v7122_v40 = vld [vmem:[%s8262_s5 + $0x10] sm:$0xf]  ;;  %s8122_s11 = scalar_lea.vmem %s8266_s9, %s5679_s15 }
  0x13   : > { %v538_v3 = vld [vmem:[%s6993_s18] sm:$0xff]  ;;  %v539_v4 = vld [vmem:[%s6993_s18 + $0x8] sm:$0xff]  ;;  %v540_v5 = vld [vmem:[%s6993_s18 + $0x10] sm:$0xff]  ;;  %505 = vst.msk [vmem:[#allocation2 + $0x67] sm:$0x1] %vm501_vm2, %v6910_v35  ;;  %6099 = vmatprep.subr.msk.mxu0 %vm1346_vm3, %v1249_v36  ;;  %6299 = vmatprep.subr.msk.mxu1 %vm1346_vm3, %v7122_v40 }
  0x14   : > { %6051 = vmatprep.mubr.msk.f32.mxu0 %vm579_vm0, %v538_v3  ;;  %v541_v6 = vld [vmem:[%s6993_s18 + $0x18] sm:$0xff]  ;;  %v542_v7 = vld [vmem:[%s6993_s18 + $0x20] sm:$0xff]  ;;  %v543_v8 = vld [vmem:[%s6993_s18 + $0x28] sm:$0xff]  ;;  %506 = vst.msk [vmem:[#allocation2 + $0x87] sm:$0x1] %vm501_vm2, %v6910_v35 }
  0x15   : > { %6052 = vmatmul.mubr.msk.f32.vlgmr.msra.gmra.mrb[0].mxu0 %vm579_vm0, %v539_v4  ;;  %v544_v9 = vld [vmem:[%s6993_s18 + $0x30] sm:$0xff]  ;;  %v545_v10 = vld [vmem:[%s6993_s18 + $0x38] sm:$0xff]  ;;  %v546_v11 = vld [vmem:[%s6993_s18 + $0x40] sm:$0xff]  ;;  %507 = vst.msk [vmem:[#allocation2 + $0xa7] sm:$0x1] %vm501_vm2, %v6910_v35 }
  0x16   : > { %6054 = vmatprep.mubr.msk.f32.mxu0 %vm579_vm0, %v540_v5  ;;  %v547_v12 = vld [vmem:[%s6993_s18 + $0x48] sm:$0xff]  ;;  %v548_v13 = vld [vmem:[%s6993_s18 + $0x50] sm:$0xff]  ;;  %v549_v14 = vld [vmem:[%s6993_s18 + $0x58] sm:$0xff]  ;;  %508 = vst.msk [vmem:[#allocation2 + $0xc7] sm:$0x1] %vm501_vm2, %v6910_v35  ;;  %6100 = vmatpush3.msk.msra.mxu0 %vm1346_vm3, %v1249_v36 }
  0x17   : > { %v550_v15 = vld [vmem:[%s6993_s18 + $0x60] sm:$0xff]  ;;  %v551_v16 = vld [vmem:[%s6993_s18 + $0x68] sm:$0xff]  ;;  %v552_v17 = vld [vmem:[%s6993_s18 + $0x70] sm:$0xff]  ;;  %509 = vst.msk [vmem:[#allocation2 + $0xe7] sm:$0x1] %vm501_vm2, %v6910_v35 }
  0x18   : > { %v553_v18 = vld [vmem:[%s6993_s18 + $0x78] sm:$0xff]  ;;  %v554_v19 = vld [vmem:[%s6993_s18 + $0x80] sm:$0xff]  ;;  %v555_v20 = vld [vmem:[%s6993_s18 + $0x88] sm:$0xff]  ;;  %511 = vst.msk [vmem:[#allocation2 + $0x127] sm:$0x1] %vm501_vm2, %v6910_v35 }
  0x19   : > { %6055 = vmatmul.mubr.msk.f32.gmra.mrb[2].mxu0 %vm579_vm0, %v541_v6  ;;  %v556_v21 = vld [vmem:[%s6993_s18 + $0x90] sm:$0xff]  ;;  %v557_v22 = vld [vmem:[%s6993_s18 + $0x98] sm:$0xff]  ;;  %v558_v23 = vld [vmem:[%s6993_s18 + $0xa0] sm:$0xff]  ;;  %512 = vst.msk [vmem:[#allocation2 + $0x147] sm:$0x1] %vm501_vm2, %v6910_v35 }
  0x1a   : > { %6057 = vmatprep.mubr.msk.f32.mxu0 %vm579_vm0, %v542_v7  ;;  %v559_v24 = vld [vmem:[%s6993_s18 + $0xa8] sm:$0xff]  ;;  %v560_v25 = vld [vmem:[%s6993_s18 + $0xb0] sm:$0xff]  ;;  %v561_v26 = vld [vmem:[%s6993_s18 + $0xb8] sm:$0xff]  ;;  %513 = vst.msk [vmem:[#allocation2 + $0x167] sm:$0x1] %vm501_vm2, %v6910_v35 }
  0x1b   : > { %v562_v27 = vld [vmem:[%s6993_s18 + $0xc0] sm:$0xff]  ;;  %v563_v28 = vld [vmem:[%s6993_s18 + $0xc8] sm:$0xff]  ;;  %v564_v29 = vld [vmem:[%s6993_s18 + $0xd0] sm:$0xff]  ;;  %514 = vst.msk [vmem:[#allocation2 + $0x187] sm:$0x1] %vm501_vm2, %v6910_v35 }
  0x1c   : > { %v565_v30 = vld [vmem:[%s6993_s18 + $0xd8] sm:$0xff]  ;;  %v566_v31 = vld [vmem:[%s6993_s18 + $0xe0] sm:$0xff]  ;;  %v567_v32 = vld [vmem:[%s6993_s18 + $0xe8] sm:$0xff]  ;;  %515 = vst.msk [vmem:[#allocation2 + $0x1a7] sm:$0x1] %vm501_vm2, %v6910_v35 }
  0x1d   : > { %6058 = vmatmul.mubr.msk.f32.gmra.mrb[4].mxu0 %vm579_vm0, %v543_v8  ;;  %v568_v33 = vld [vmem:[%s6993_s18 + $0xf0] sm:$0xff]  ;;  %v569_v34 = vld [vmem:[%s6993_s18 + $0xf8] sm:$0xff]  ;;  %516 = vst.msk [vmem:[#allocation2 + $0x1c7] sm:$0x1] %vm501_vm2, %v6910_v35  ;;  %517 = vst.msk [vmem:[#allocation2 + $0x1e7] sm:$0x1] %vm501_vm2, %v6910_v35 }
  0x1e   : > { %6060 = vmatprep.mubr.msk.f32.mxu0 %vm579_vm0, %v544_v9  ;;  %518 = vst.msk [vmem:[#allocation2 + $0x207] sm:$0x1] %vm501_vm2, %v6910_v35  ;;  %519 = vst.msk [vmem:[#allocation2 + $0x227] sm:$0x1] %vm501_vm2, %v6910_v35  ;;  %v1217_v37 = vld [vmem:[#allocation2 + $0x8] sm:$0xff]  ;;  %v1218_v38 = vld [vmem:[#allocation2 + $0x10] sm:$0xff] }
  0x1f   : > { %520 = vst.msk [vmem:[#allocation2 + $0x18] sm:$0x1] %vm501_vm2, %v6910_v35  ;;  %521 = vst.msk [vmem:[#allocation2 + $0x38] sm:$0x1] %vm501_vm2, %v6910_v35  ;;  %v1216_v41 = vld [vmem:[%s8262_s5] sm:$0xf] }
  0x20   : > { %522 = vst.msk [vmem:[#allocation2 + $0x58] sm:$0x1] %vm501_vm2, %v6910_v35  ;;  %523 = vst.msk [vmem:[#allocation2 + $0x78] sm:$0x1] %vm501_vm2, %v6910_v35  ;;  %6149 = vmatprep.subr.msk.mxu0 %vm1346_vm3, %v1216_v41  ;;  %v7134_v42 = vld [vmem:[%s8261_s4] ss:$0 sm:$0xff] }
  0x21   : > { %6061 = vmatmul.mubr.msk.f32.gmra.mrb[6].mxu0 %vm579_vm0, %v545_v10  ;;  %524 = vst.msk [vmem:[#allocation2 + $0x98] sm:$0x1] %vm501_vm2, %v6910_v35  ;;  %525 = vst.msk [vmem:[#allocation2 + $0xb8] sm:$0x1] %vm501_vm2, %v6910_v35  ;;  %v7145_v56 = vld [vmem:[%s8262_s5 + $0x8] sm:$0xf] }
  0x22   : > { %6063 = vmatprep.mubr.msk.f32.mxu0 %vm579_vm0, %v546_v11  ;;  %526 = vst.msk [vmem:[#allocation2 + $0xd8] sm:$0x1] %vm501_vm2, %v6910_v35  ;;  %527 = vst.msk [vmem:[#allocation2 + $0xf8] sm:$0x1] %vm501_vm2, %v6910_v35 }
  0x23   : > { %528 = vst.msk [vmem:[#allocation2 + $0x118] sm:$0x1] %vm501_vm2, %v6910_v35  ;;  %529 = vst.msk [vmem:[#allocation2 + $0x138] sm:$0x1] %vm501_vm2, %v6910_v35 }
  0x24   : > { %530 = vst.msk [vmem:[#allocation2 + $0x158] sm:$0x1] %vm501_vm2, %v6910_v35  ;;  %531 = vst.msk [vmem:[#allocation2 + $0x178] sm:$0x1] %vm501_vm2, %v6910_v35 }
  0x25   : > { %6064 = vmatmul.mubr.msk.f32.gmra.mrb[8].mxu0 %vm579_vm0, %v547_v12  ;;  %532 = vst.msk [vmem:[#allocation2 + $0x198] sm:$0x1] %vm501_vm2, %v6910_v35  ;;  %533 = vst.msk [vmem:[#allocation2 + $0x1b8] sm:$0x1] %vm501_vm2, %v6910_v35 }
  0x26   : > { %6066 = vmatprep.mubr.msk.f32.mxu0 %vm579_vm0, %v548_v13  ;;  %534 = vst.msk [vmem:[#allocation2 + $0x1d8] sm:$0x1] %vm501_vm2, %v6910_v35  ;;  %535 = vst.msk [vmem:[#allocation2 + $0x1f8] sm:$0x1] %vm501_vm2, %v6910_v35 }
  0x27   : > { %536 = vst.msk [vmem:[#allocation2 + $0x218] sm:$0x1] %vm501_vm2, %v6910_v35  ;;  %537 = vst.msk [vmem:[#allocation2 + $0x238] sm:$0x1] %vm501_vm2, %v6910_v35 }
  0x28   : > { %1071 = vst.msk [vmem:[#allocation2] sm:$0xff] %vm934_vm1, %v6910_v35  ;;  %1180 = vst.msk [vmem:[#allocation2 + $0x220] sm:$0xff] %vm934_vm1, %v6910_v35 }
  0x29   : > { %6067 = vmatmul.mubr.msk.f32.gmra.mrb[10].mxu0 %vm579_vm0, %v549_v14  ;;  %1074 = vst.msk [vmem:[#allocation2 + $0x18] sm:$0x1] %vm501_vm2, %v6910_v35  ;;  %1183 = vst.msk [vmem:[#allocation2 + $0x238] sm:$0x1] %vm501_vm2, %v6910_v35 }
  0x2a   : > { %6069 = vmatprep.mubr.msk.f32.mxu0 %vm579_vm0, %v550_v15 }
  0x2d   : > { %6070 = vmatmul.mubr.msk.f32.gmra.mrb[12].mxu0 %vm579_vm0, %v551_v16 }
  0x2e   : > { %6072 = vmatprep.mubr.msk.f32.mxu0 %vm579_vm0, %v552_v17 }
  0x31   : > { %6073 = vmatmul.mubr.msk.f32.gmra.mrb[14].mxu0 %vm579_vm0, %v553_v18 }
  0x32   : > { %6075 = vmatprep.mubr.msk.f32.mxu0 %vm579_vm0, %v554_v19 }
  0x35   : > { %6076 = vmatmul.mubr.msk.f32.gmra.mrb[16].mxu0 %vm579_vm0, %v555_v20 }
  0x36   : > { %6078 = vmatprep.mubr.msk.f32.mxu0 %vm579_vm0, %v556_v21 }
  0x39   : > { %6079 = vmatmul.mubr.msk.f32.gmra.mrb[18].mxu0 %vm579_vm0, %v557_v22 }
  0x3a   : > { %6081 = vmatprep.mubr.msk.f32.mxu0 %vm579_vm0, %v558_v23 }
  0x3d   : > { %6082 = vmatmul.mubr.msk.f32.gmra.mrb[20].mxu0 %vm579_vm0, %v559_v24 }
  0x3e   : > { %6084 = vmatprep.mubr.msk.f32.mxu0 %vm579_vm0, %v560_v25 }
  0x41   : > { %6085 = vmatmul.mubr.msk.f32.gmra.mrb[22].mxu0 %vm579_vm0, %v561_v26 }
  0x42   : > { %6087 = vmatprep.mubr.msk.f32.mxu0 %vm579_vm0, %v562_v27 }
  0x45   : > { %6088 = vmatmul.mubr.msk.f32.gmra.mrb[24].mxu0 %vm579_vm0, %v563_v28 }
  0x46   : > { %6090 = vmatprep.mubr.msk.f32.mxu0 %vm579_vm0, %v564_v29 }
  0x49   : > { %6091 = vmatmul.mubr.msk.f32.gmra.mrb[26].mxu0 %vm579_vm0, %v565_v30 }
  0x4a   : > { %6093 = vmatprep.mubr.msk.f32.mxu0 %vm579_vm0, %v566_v31 }
  0x4d   : > { %6094 = vmatmul.mubr.msk.f32.gmra.mrb[28].mxu0 %vm579_vm0, %v567_v32 }
  0x4e   : > { %6096 = vmatprep.mubr.msk.f32.mxu0 %vm579_vm0, %v568_v33 }
  0x51   : > { %6097 = vmatmul.mubr.msk.f32.gmra.mrb[30].mxu0 %vm579_vm0, %v569_v34 }
  0x52   : > { %6101 = vmatprep.mubr.msk.f32.mxu0 %vm934_vm1, %v1217_v37 }
  0x55   : > { %6102 = vmatmul.mubr.msk.f32.vlgmr.msra.gmra.mrb[32].mxu0 %vm934_vm1, %v1218_v38 }
  0x56   : > { %6150 = vmatpush3.msk.msra.mxu0 %vm1346_vm3, %v1216_v41 }
  0x57   : > { %6199 = vmatprep.subr.msk.mxu0 %vm1346_vm3, %v7145_v56 }
  0xe8   : > { %v6053_v43 = vpop.f32.mrb[0].mxu0 }
  0xe9   : > { %v748_v44 = vadd.f32 %v6053_v43, %v7134_v42  ;;  %v742_v45 = vpop.f32.mrb[1].mxu0 }
  0xea   : > { %v743_v46 = vadd.f32 %v7134_v42, %v742_v45 }
  0xeb   : > { %v902_v47 = vmax.f32 %v748_v44, 0.0 }
  0xec   : > { %v901_v48 = vmax.f32 %v743_v46, 0.0  ;;  %v6056_v49 = vpop.f32.mrb[2].mxu0 }
  0xed   : > { %936 = vst.msk [vmem:[#allocation2 + $0x30] sm:$0xff] %vm934_vm1, %v902_v47  ;;  %v758_v50 = vadd.f32 %v6056_v49, %v7134_v42  ;;  %v752_v51 = vpop.f32.mrb[3].mxu0 }
  0xee   : > { %935 = vst.msk [vmem:[#allocation2 + $0x28] sm:$0xff] %vm934_vm1, %v901_v48  ;;  %v753_v52 = vadd.f32 %v7134_v42, %v752_v51 }
  0xef   : > { %v904_v53 = vmax.f32 %v758_v50, 0.0 }
  0xf0   : > { %v903_v54 = vmax.f32 %v753_v52, 0.0  ;;  %v6059_v55 = vpop.f32.mrb[4].mxu0 }
  0xf1   : > { %938 = vst.msk [vmem:[#allocation2 + $0x50] sm:$0xff] %vm934_vm1, %v904_v53  ;;  %v768_v57 = vadd.f32 %v6059_v55, %v7134_v42  ;;  %v762_v58 = vpop.f32.mrb[5].mxu0 }
  0xf2   : > { %937 = vst.msk [vmem:[#allocation2 + $0x48] sm:$0xff] %vm934_vm1, %v903_v54  ;;  %v763_v59 = vadd.f32 %v7134_v42, %v762_v58 }
  0xf3   : > { %v906_v60 = vmax.f32 %v768_v57, 0.0 }
  0xf4   : > { %v905_v61 = vmax.f32 %v763_v59, 0.0  ;;  %v6062_v62 = vpop.f32.mrb[6].mxu0  ;;  %v7161_v3 = vld [vmem:[#allocation2 + $0x30] sm:$0xff] }
  0xf5   : > { %940 = vst.msk [vmem:[#allocation2 + $0x70] sm:$0xff] %vm934_vm1, %v906_v60  ;;  %v778_v63 = vadd.f32 %v6062_v62, %v7134_v42  ;;  %v772_v0 = vpop.f32.mrb[7].mxu0  ;;  %v7155_v1 = vld [vmem:[#allocation2 + $0x28] sm:$0xff] }
  0xf6   : > { %939 = vst.msk [vmem:[#allocation2 + $0x68] sm:$0xff] %vm934_vm1, %v905_v61  ;;  %v773_v2 = vadd.f32 %v7134_v42, %v772_v0  ;;  %6104 = vmatprep.mubr.msk.f32.mxu0 %vm934_vm1, %v7155_v1 }
  0xf7   : > { %v908_v4 = vmax.f32 %v778_v63, 0.0  ;;  %6105 = vmatmul.mubr.msk.f32.gmra.mrb[34].mxu0 %vm934_vm1, %v7161_v3 }
  0xf8   : > { %v907_v5 = vmax.f32 %v773_v2, 0.0  ;;  %v6065_v6 = vpop.f32.mrb[8].mxu0  ;;  %v7173_v11 = vld [vmem:[#allocation2 + $0x50] sm:$0xff] }
  0xf9   : > { %942 = vst.msk [vmem:[#allocation2 + $0x90] sm:$0xff] %vm934_vm1, %v908_v4  ;;  %v788_v7 = vadd.f32 %v6065_v6, %v7134_v42  ;;  %v782_v8 = vpop.f32.mrb[9].mxu0  ;;  %v7167_v9 = vld [vmem:[#allocation2 + $0x48] sm:$0xff]  ;;  %v7256_v4 = vld [vmem:[%s8262_s5 + $0x14] sm:$0xf] }
  0xfa   : > { %941 = vst.msk [vmem:[#allocation2 + $0x88] sm:$0xff] %vm934_vm1, %v907_v5  ;;  %v783_v10 = vadd.f32 %v7134_v42, %v782_v8  ;;  %6107 = vmatprep.mubr.msk.f32.mxu0 %vm934_vm1, %v7167_v9 }
  0xfb   : > { %v910_v12 = vmax.f32 %v788_v7, 0.0  ;;  %6108 = vmatmul.mubr.msk.f32.gmra.mrb[36].mxu0 %vm934_vm1, %v7173_v11 }
  0xfc   : > { %v909_v13 = vmax.f32 %v783_v10, 0.0  ;;  %v6068_v14 = vpop.f32.mrb[10].mxu0  ;;  %v7185_v19 = vld [vmem:[#allocation2 + $0x70] sm:$0xff] }
  0xfd   : > { %944 = vst.msk [vmem:[#allocation2 + $0xb0] sm:$0xff] %vm934_vm1, %v910_v12  ;;  %v798_v15 = vadd.f32 %v6068_v14, %v7134_v42  ;;  %v792_v16 = vpop.f32.mrb[11].mxu0  ;;  %v7179_v17 = vld [vmem:[#allocation2 + $0x68] sm:$0xff] }
  0xfe   : > { %943 = vst.msk [vmem:[#allocation2 + $0xa8] sm:$0xff] %vm934_vm1, %v909_v13  ;;  %v793_v18 = vadd.f32 %v7134_v42, %v792_v16  ;;  %6110 = vmatprep.mubr.msk.f32.mxu0 %vm934_vm1, %v7179_v17 }
  0xff   : > { %v912_v20 = vmax.f32 %v798_v15, 0.0  ;;  %6111 = vmatmul.mubr.msk.f32.gmra.mrb[38].mxu0 %vm934_vm1, %v7185_v19 }
 0x100   : > { %v911_v21 = vmax.f32 %v793_v18, 0.0  ;;  %v6071_v22 = vpop.f32.mrb[12].mxu0  ;;  %v7197_v27 = vld [vmem:[#allocation2 + $0x90] sm:$0xff] }
 0x101   : > { %946 = vst.msk [vmem:[#allocation2 + $0xd0] sm:$0xff] %vm934_vm1, %v912_v20  ;;  %v808_v23 = vadd.f32 %v6071_v22, %v7134_v42  ;;  %v802_v24 = vpop.f32.mrb[13].mxu0  ;;  %v7191_v25 = vld [vmem:[#allocation2 + $0x88] sm:$0xff] }
 0x102   : > { %945 = vst.msk [vmem:[#allocation2 + $0xc8] sm:$0xff] %vm934_vm1, %v911_v21  ;;  %v803_v26 = vadd.f32 %v7134_v42, %v802_v24  ;;  %6113 = vmatprep.mubr.msk.f32.mxu0 %vm934_vm1, %v7191_v25 }
 0x103   : > { %v914_v28 = vmax.f32 %v808_v23, 0.0  ;;  %6114 = vmatmul.mubr.msk.f32.gmra.mrb[40].mxu0 %vm934_vm1, %v7197_v27 }
 0x104   : > { %v913_v29 = vmax.f32 %v803_v26, 0.0  ;;  %v6074_v30 = vpop.f32.mrb[14].mxu0  ;;  %v7209_v35 = vld [vmem:[#allocation2 + $0xb0] sm:$0xff] }
 0x105   : > { %948 = vst.msk [vmem:[#allocation2 + $0xf0] sm:$0xff] %vm934_vm1, %v914_v28  ;;  %v818_v31 = vadd.f32 %v6074_v30, %v7134_v42  ;;  %v812_v32 = vpop.f32.mrb[15].mxu0  ;;  %v7203_v33 = vld [vmem:[#allocation2 + $0xa8] sm:$0xff] }
 0x106   : > { %947 = vst.msk [vmem:[#allocation2 + $0xe8] sm:$0xff] %vm934_vm1, %v913_v29  ;;  %v813_v34 = vadd.f32 %v7134_v42, %v812_v32  ;;  %6116 = vmatprep.mubr.msk.f32.mxu0 %vm934_vm1, %v7203_v33 }
 0x107   : > { %v916_v36 = vmax.f32 %v818_v31, 0.0  ;;  %6117 = vmatmul.mubr.msk.f32.gmra.mrb[42].mxu0 %vm934_vm1, %v7209_v35 }
 0x108   : > { %v915_v37 = vmax.f32 %v813_v34, 0.0  ;;  %v6077_v38 = vpop.f32.mrb[16].mxu0  ;;  %v7221_v46 = vld [vmem:[#allocation2 + $0xd0] sm:$0xff] }
 0x109   : > { %950 = vst.msk [vmem:[#allocation2 + $0x110] sm:$0xff] %vm934_vm1, %v916_v36  ;;  %v828_v41 = vadd.f32 %v6077_v38, %v7134_v42  ;;  %v822_v43 = vpop.f32.mrb[17].mxu0  ;;  %v7215_v44 = vld [vmem:[#allocation2 + $0xc8] sm:$0xff] }
 0x10a   : > { %949 = vst.msk [vmem:[#allocation2 + $0x108] sm:$0xff] %vm934_vm1, %v915_v37  ;;  %v823_v45 = vadd.f32 %v7134_v42, %v822_v43  ;;  %6119 = vmatprep.mubr.msk.f32.mxu0 %vm934_vm1, %v7215_v44 }
 0x10b   : > { %v918_v47 = vmax.f32 %v828_v41, 0.0  ;;  %6120 = vmatmul.mubr.msk.f32.gmra.mrb[44].mxu0 %vm934_vm1, %v7221_v46 }
 0x10c   : > { %v917_v48 = vmax.f32 %v823_v45, 0.0  ;;  %v6080_v49 = vpop.f32.mrb[18].mxu0  ;;  %v7233_v54 = vld [vmem:[#allocation2 + $0xf0] sm:$0xff] }
 0x10d   : > { %952 = vst.msk [vmem:[#allocation2 + $0x130] sm:$0xff] %vm934_vm1, %v918_v47  ;;  %v838_v50 = vadd.f32 %v6080_v49, %v7134_v42  ;;  %v832_v51 = vpop.f32.mrb[19].mxu0  ;;  %v7227_v52 = vld [vmem:[#allocation2 + $0xe8] sm:$0xff] }
 0x10e   : > { %951 = vst.msk [vmem:[#allocation2 + $0x128] sm:$0xff] %vm934_vm1, %v917_v48  ;;  %v833_v53 = vadd.f32 %v7134_v42, %v832_v51  ;;  %6122 = vmatprep.mubr.msk.f32.mxu0 %vm934_vm1, %v7227_v52 }
 0x10f   : > { %v920_v55 = vmax.f32 %v838_v50, 0.0  ;;  %6123 = vmatmul.mubr.msk.f32.gmra.mrb[46].mxu0 %vm934_vm1, %v7233_v54 }
 0x110   : > { %v919_v57 = vmax.f32 %v833_v53, 0.0  ;;  %v6083_v58 = vpop.f32.mrb[20].mxu0  ;;  %v7251_v2 = vld [vmem:[#allocation2 + $0x110] sm:$0xff] }
 0x111   : > { %954 = vst.msk [vmem:[#allocation2 + $0x150] sm:$0xff] %vm934_vm1, %v920_v55  ;;  %v848_v59 = vadd.f32 %v6083_v58, %v7134_v42  ;;  %v842_v60 = vpop.f32.mrb[21].mxu0  ;;  %v7239_v61 = vld [vmem:[#allocation2 + $0x108] sm:$0xff] }
 0x112   : > { %v7241_v62 = vld [vmem:[#allocation2 + $0x107] sm:$0xff]  ;;  %v7243_v63 = vld [vmem:[#allocation2 + $0x10f] sm:$0xff]  ;;  %953 = vst.msk [vmem:[#allocation2 + $0x148] sm:$0xff] %vm934_vm1, %v919_v57  ;;  %v843_v0 = vadd.f32 %v7134_v42, %v842_v60  ;;  %6125 = vmatprep.mubr.msk.f32.mxu0 %vm934_vm1, %v7239_v61 }
 0x113   : > { %6272 = vmatprep.mubr.msk.f32.mxu1 %vm934_vm1, %v7241_v62  ;;  %v922_v5 = vmax.f32 %v848_v59, 0.0  ;;  %6126 = vmatmul.mubr.msk.f32.gmra.mrb[48].mxu0 %vm934_vm1, %v7251_v2 }
 0x114   : > { %6273 = vmatmul.mubr.msk.f32.vlgmr.msra.gmra.mrb[0].mxu1 %vm934_vm1, %v7243_v63  ;;  %v921_v6 = vmax.f32 %v843_v0, 0.0  ;;  %v6086_v7 = vpop.f32.mrb[22].mxu0 }
 0x115   : > { %6300 = vmatpush3.msk.msra.mxu1 %vm1346_vm3, %v7122_v40  ;;  %956 = vst.msk [vmem:[#allocation2 + $0x170] sm:$0xff] %vm934_vm1, %v922_v5  ;;  %v858_v8 = vadd.f32 %v6086_v7, %v7134_v42  ;;  %v852_v10 = vpop.f32.mrb[23].mxu0  ;;  %v7266_v12 = vld [vmem:[#allocation2 + $0x128] sm:$0xff]  ;;  %v7280_v40 = vld [vmem:[#allocation2 + $0x130] sm:$0xff] }
 0x116   : > { %v7268_v13 = vld [vmem:[#allocation2 + $0x127] sm:$0xff]  ;;  %v7270_v14 = vld [vmem:[#allocation2 + $0x12f] sm:$0xff]  ;;  %6349 = vmatprep.subr.msk.mxu1 %vm1346_vm3, %v7256_v4  ;;  %955 = vst.msk [vmem:[#allocation2 + $0x168] sm:$0xff] %vm934_vm1, %v921_v6  ;;  %v853_v15 = vadd.f32 %v7134_v42, %v852_v10  ;;  %6128 = vmatprep.mubr.msk.f32.mxu0 %vm934_vm1, %v7266_v12 }
 0x117   : > { %6275 = vmatprep.mubr.msk.f32.mxu1 %vm934_vm1, %v7268_v13  ;;  %v924_v16 = vmax.f32 %v858_v8, 0.0  ;;  %6129 = vmatmul.mubr.msk.f32.gmra.mrb[50].mxu0 %vm934_vm1, %v7280_v40 }
 0x118   : > { %6276 = vmatmul.mubr.msk.f32.gmra.mrb[2].mxu1 %vm934_vm1, %v7270_v14  ;;  %v923_v18 = vmax.f32 %v853_v15, 0.0  ;;  %v6089_v20 = vpop.f32.mrb[24].mxu0  ;;  %v7300_v29 = vld [vmem:[#allocation2 + $0x150] sm:$0xff] }
 0x119   : > { %958 = vst.msk [vmem:[#allocation2 + $0x190] sm:$0xff] %vm934_vm1, %v924_v16  ;;  %v868_v21 = vadd.f32 %v6089_v20, %v7134_v42  ;;  %v862_v22 = vpop.f32.mrb[25].mxu0  ;;  %v7288_v23 = vld [vmem:[#allocation2 + $0x148] sm:$0xff] }
 0x11a   : > { %v7290_v24 = vld [vmem:[#allocation2 + $0x147] sm:$0xff]  ;;  %v7292_v26 = vld [vmem:[#allocation2 + $0x14f] sm:$0xff]  ;;  %957 = vst.msk [vmem:[#allocation2 + $0x188] sm:$0xff] %vm934_vm1, %v923_v18  ;;  %v863_v28 = vadd.f32 %v7134_v42, %v862_v22  ;;  %6131 = vmatprep.mubr.msk.f32.mxu0 %vm934_vm1, %v7288_v23 }
 0x11b   : > { %6278 = vmatprep.mubr.msk.f32.mxu1 %vm934_vm1, %v7290_v24  ;;  %v926_v30 = vmax.f32 %v868_v21, 0.0  ;;  %6132 = vmatmul.mubr.msk.f32.gmra.mrb[52].mxu0 %vm934_vm1, %v7300_v29 }
 0x11c   : > { %6279 = vmatmul.mubr.msk.f32.gmra.mrb[4].mxu1 %vm934_vm1, %v7292_v26  ;;  %v925_v31 = vmax.f32 %v863_v28, 0.0  ;;  %v6092_v32 = vpop.f32.mrb[26].mxu0  ;;  %v7320_v45 = vld [vmem:[#allocation2 + $0x170] sm:$0xff] }
 0x11d   : > { %960 = vst.msk [vmem:[#allocation2 + $0x1b0] sm:$0xff] %vm934_vm1, %v926_v30  ;;  %v878_v34 = vadd.f32 %v6092_v32, %v7134_v42  ;;  %v872_v36 = vpop.f32.mrb[27].mxu0  ;;  %v7308_v37 = vld [vmem:[#allocation2 + $0x168] sm:$0xff] }
 0x11e   : > { %v7310_v38 = vld [vmem:[#allocation2 + $0x167] sm:$0xff]  ;;  %v7312_v41 = vld [vmem:[#allocation2 + $0x16f] sm:$0xff]  ;;  %959 = vst.msk [vmem:[#allocation2 + $0x1a8] sm:$0xff] %vm934_vm1, %v925_v31  ;;  %v873_v43 = vadd.f32 %v7134_v42, %v872_v36  ;;  %6134 = vmatprep.mubr.msk.f32.mxu0 %vm934_vm1, %v7308_v37 }
 0x11f   : > { %6281 = vmatprep.mubr.msk.f32.mxu1 %vm934_vm1, %v7310_v38  ;;  %v928_v47 = vmax.f32 %v878_v34, 0.0  ;;  %6135 = vmatmul.mubr.msk.f32.gmra.mrb[54].mxu0 %vm934_vm1, %v7320_v45  ;;  %v1184_v31 = vld [vmem:[#allocation2 + $0x7] sm:$0xff] }
 0x120   : > { %6282 = vmatmul.mubr.msk.f32.gmra.mrb[6].mxu1 %vm934_vm1, %v7312_v41  ;;  %v927_v48 = vmax.f32 %v873_v43, 0.0  ;;  %v6095_v49 = vpop.f32.mrb[28].mxu0  ;;  %v7340_v59 = vld [vmem:[#allocation2 + $0x190] sm:$0xff] }
 0x121   : > { %962 = vst.msk [vmem:[#allocation2 + $0x1d0] sm:$0xff] %vm934_vm1, %v928_v47  ;;  %v888_v50 = vadd.f32 %v6095_v49, %v7134_v42  ;;  %v882_v51 = vpop.f32.mrb[29].mxu0  ;;  %v7328_v53 = vld [vmem:[#allocation2 + $0x188] sm:$0xff] }
 0x122   : > { %v7330_v55 = vld [vmem:[#allocation2 + $0x187] sm:$0xff]  ;;  %v7332_v57 = vld [vmem:[#allocation2 + $0x18f] sm:$0xff]  ;;  %961 = vst.msk [vmem:[#allocation2 + $0x1c8] sm:$0xff] %vm934_vm1, %v927_v48  ;;  %v883_v58 = vadd.f32 %v7134_v42, %v882_v51  ;;  %6137 = vmatprep.mubr.msk.f32.mxu0 %vm934_vm1, %v7328_v53 }
 0x123   : > { %6284 = vmatprep.mubr.msk.f32.mxu1 %vm934_vm1, %v7330_v55  ;;  %v930_v60 = vmax.f32 %v888_v50, 0.0  ;;  %6138 = vmatmul.mubr.msk.f32.gmra.mrb[56].mxu0 %vm934_vm1, %v7340_v59  ;;  %v1185_v47 = vld [vmem:[#allocation2 + $0xf] sm:$0xff]  ;;  %v7410_v50 = vld [vmem:[#allocation2 + $0x27] sm:$0xff] }
 0x124   : > { %6285 = vmatmul.mubr.msk.f32.gmra.mrb[8].mxu1 %vm934_vm1, %v7332_v57  ;;  %v929_v0 = vmax.f32 %v883_v58, 0.0  ;;  %v6098_v5 = vpop.f32.mrb[30].mxu0  ;;  %v7360_v18 = vld [vmem:[#allocation2 + $0x1b0] sm:$0xff]  ;;  %v7423_v58 = vld [vmem:[%s8262_s5 + $0x18] sm:$0xf] }
 0x125   : > { %964 = vst.msk [vmem:[#allocation2 + $0x1f0] sm:$0xff] %vm934_vm1, %v930_v60  ;;  %v898_v6 = vadd.f32 %v6098_v5, %v7134_v42  ;;  %v892_v7 = vpop.f32.mrb[31].mxu0  ;;  %v7348_v8 = vld [vmem:[#allocation2 + $0x1a8] sm:$0xff]  ;;  %v1902_v60 = vld [vmem:[#allocation2 + $0x31] sm:$0xff] }
 0x126   : > { %v7350_v10 = vld [vmem:[#allocation2 + $0x1a7] sm:$0xff]  ;;  %v7352_v15 = vld [vmem:[#allocation2 + $0x1af] sm:$0xff]  ;;  %963 = vst.msk [vmem:[#allocation2 + $0x1e8] sm:$0xff] %vm934_vm1, %v929_v0  ;;  %v893_v16 = vadd.f32 %v7134_v42, %v892_v7  ;;  %6140 = vmatprep.mubr.msk.f32.mxu0 %vm934_vm1, %v7348_v8  ;;  %v7588_v0 = vld [vmem:[%s8262_s5 + $0x1c] sm:$0xf] }
 0x127   : > { %6287 = vmatprep.mubr.msk.f32.mxu1 %vm934_vm1, %v7350_v10  ;;  %v932_v20 = vmax.f32 %v898_v6, 0.0  ;;  %6141 = vmatmul.mubr.msk.f32.gmra.mrb[58].mxu0 %vm934_vm1, %v7360_v18  ;;  %v7418_v51 = vld [vmem:[#allocation2 + $0x2f] sm:$0xff] }
 0x128   : > { %6288 = vmatmul.mubr.msk.f32.gmra.mrb[10].mxu1 %vm934_vm1, %v7352_v15  ;;  %v931_v21 = vmax.f32 %v893_v16, 0.0  ;;  %v7378_v30 = vld [vmem:[#allocation2 + $0x1d0] sm:$0xff] }
 0x129   : > { %966 = vst.msk [vmem:[#allocation2 + $0x210] sm:$0xff] %vm934_vm1, %v932_v20  ;;  %v7367_v22 = vld [vmem:[#allocation2 + $0x1c8] sm:$0xff]  ;;  %v7614_v7 = vld [vmem:[#allocation2 + $0x71] sm:$0xff] }
 0x12a   : > { %v7369_v42 = vld [vmem:[#allocation2 + $0x1c7] sm:$0xff]  ;;  %v7371_v28 = vld [vmem:[#allocation2 + $0x1cf] sm:$0xff]  ;;  %965 = vst.msk [vmem:[#allocation2 + $0x208] sm:$0xff] %vm934_vm1, %v931_v21  ;;  %6143 = vmatprep.mubr.msk.f32.mxu0 %vm934_vm1, %v7367_v22 }
 0x12b   : > { %6290 = vmatprep.mubr.msk.f32.mxu1 %vm934_vm1, %v7369_v42  ;;  %6144 = vmatmul.mubr.msk.f32.gmra.mrb[60].mxu0 %vm934_vm1, %v7378_v30  ;;  %v7592_v5 = vld [vmem:[#allocation2 + $0x49] sm:$0xff]  ;;  %v7626_v20 = vld [vmem:[#allocation2 + $0x91] sm:$0xff] }
 0x12c   : > { %6291 = vmatmul.mubr.msk.f32.gmra.mrb[12].mxu1 %vm934_vm1, %v7371_v28  ;;  %v7394_v43 = vld [vmem:[#allocation2 + $0x1f0] sm:$0xff] }
 0x12d   : > { %v7384_v32 = vld [vmem:[#allocation2 + $0x1e8] sm:$0xff] }
 0x12e   : > { %v7386_v34 = vld [vmem:[#allocation2 + $0x1e7] sm:$0xff]  ;;  %v7388_v36 = vld [vmem:[#allocation2 + $0x1ef] sm:$0xff]  ;;  %6146 = vmatprep.mubr.msk.f32.mxu0 %vm934_vm1, %v7384_v32 }
 0x12f   : > { %6293 = vmatprep.mubr.msk.f32.mxu1 %vm934_vm1, %v7386_v34  ;;  %6147 = vmatmul.mubr.msk.f32.gmra.mrb[62].mxu0 %vm934_vm1, %v7394_v43  ;;  %v7608_v6 = vld [vmem:[#allocation2 + $0x69] sm:$0xff] }
 0x130   : > { %6294 = vmatmul.mubr.msk.f32.gmra.mrb[14].mxu1 %vm934_vm1, %v7388_v36  ;;  %6151 = vmatprep.mubr.msk.f32.mxu0 %vm934_vm1, %v1184_v31  ;;  %v7620_v16 = vld [vmem:[#allocation2 + $0x89] sm:$0xff]  ;;  %v7638_v31 = vld [vmem:[#allocation2 + $0xb1] sm:$0xff] }
 0x131   : > { %v7401_v48 = vld [vmem:[#allocation2 + $0x207] sm:$0xff]  ;;  %v7403_v49 = vld [vmem:[#allocation2 + $0x20f] sm:$0xff] }
 0x132   : > { %6296 = vmatprep.mubr.msk.f32.mxu1 %vm934_vm1, %v7401_v48  ;;  %v7632_v21 = vld [vmem:[#allocation2 + $0xa9] sm:$0xff] }
 0x133   : > { %6152 = vmatmul.mubr.msk.f32.vlgmr.msra.gmra.mrb[32].mxu0 %vm934_vm1, %v1185_v47  ;;  %v7644_v47 = vld [vmem:[#allocation2 + $0xc9] sm:$0xff] }
 0x134   : > { %6297 = vmatmul.mubr.msk.f32.gmra.mrb[16].mxu1 %vm934_vm1, %v7403_v49  ;;  %6154 = vmatprep.mubr.msk.f32.mxu0 %vm934_vm1, %v7410_v50 }
 0x135   : > { %6301 = vmatprep.mubr.msk.f32.mxu1 %vm934_vm1, %v7155_v1  ;;  %6200 = vmatpush3.msk.msra.mxu0 %vm1346_vm3, %v7145_v56  ;;  %v7431_v1 = vld [vmem:[#allocation2 + $0x47] sm:$0xff]  ;;  %v7441_v56 = vld [vmem:[#allocation2 + $0x4f] sm:$0xff] }
 0x136   : > { %6249 = vmatprep.subr.msk.mxu0 %vm1346_vm3, %v7113_v39 }
 0x137   : > { %6155 = vmatmul.mubr.msk.f32.gmra.mrb[34].mxu0 %vm934_vm1, %v7418_v51 }
 0x138   : > { %6302 = vmatmul.mubr.msk.f32.vlgmr.msra.gmra.mrb[18].mxu1 %vm934_vm1, %v7161_v3  ;;  %6157 = vmatprep.mubr.msk.f32.mxu0 %vm934_vm1, %v7431_v1  ;;  %v7447_v3 = vld [vmem:[#allocation2 + $0x67] sm:$0xff] }
 0x139   : > { %6350 = vmatpush3.msk.msra.mxu1 %vm1346_vm3, %v7256_v4  ;;  %6304 = vmatprep.mubr.msk.f32.mxu1 %vm934_vm1, %v7167_v9  ;;  %v7453_v9 = vld [vmem:[#allocation2 + $0x6f] sm:$0xff]  ;;  %v7459_v4 = vld [vmem:[#allocation2 + $0x87] sm:$0xff] }
 0x13a   : > { %6399 = vmatprep.subr.msk.mxu1 %vm1346_vm3, %v7423_v58 }
 0x13b   : > { %6158 = vmatmul.mubr.msk.f32.gmra.mrb[36].mxu0 %vm934_vm1, %v7441_v56 }
 0x13c   : > { %6305 = vmatmul.mubr.msk.f32.gmra.mrb[20].mxu1 %vm934_vm1, %v7173_v11  ;;  %6160 = vmatprep.mubr.msk.f32.mxu0 %vm934_vm1, %v7447_v3  ;;  %v7465_v11 = vld [vmem:[#allocation2 + $0x8f] sm:$0xff] }
 0x13d   : > { %6307 = vmatprep.mubr.msk.f32.mxu1 %vm934_vm1, %v7179_v17  ;;  %v7471_v17 = vld [vmem:[#allocation2 + $0xa7] sm:$0xff] }
 0x13f   : > { %6161 = vmatmul.mubr.msk.f32.gmra.mrb[38].mxu0 %vm934_vm1, %v7453_v9 }
 0x140   : > { %6308 = vmatmul.mubr.msk.f32.gmra.mrb[22].mxu1 %vm934_vm1, %v7185_v19  ;;  %6163 = vmatprep.mubr.msk.f32.mxu0 %vm934_vm1, %v7459_v4  ;;  %v7477_v19 = vld [vmem:[#allocation2 + $0xaf] sm:$0xff] }
 0x141   : > { %6310 = vmatprep.mubr.msk.f32.mxu1 %vm934_vm1, %v7191_v25  ;;  %v7483_v25 = vld [vmem:[#allocation2 + $0xc7] sm:$0xff] }
 0x143   : > { %6164 = vmatmul.mubr.msk.f32.gmra.mrb[40].mxu0 %vm934_vm1, %v7465_v11 }
 0x144   : > { %6311 = vmatmul.mubr.msk.f32.gmra.mrb[24].mxu1 %vm934_vm1, %v7197_v27  ;;  %6166 = vmatprep.mubr.msk.f32.mxu0 %vm934_vm1, %v7471_v17  ;;  %v7489_v27 = vld [vmem:[#allocation2 + $0xcf] sm:$0xff] }
 0x145   : > { %6313 = vmatprep.mubr.msk.f32.mxu1 %vm934_vm1, %v7203_v33  ;;  %v7495_v33 = vld [vmem:[#allocation2 + $0xe7] sm:$0xff] }
 0x147   : > { %6167 = vmatmul.mubr.msk.f32.gmra.mrb[42].mxu0 %vm934_vm1, %v7477_v19 }
 0x148   : > { %6314 = vmatmul.mubr.msk.f32.gmra.mrb[26].mxu1 %vm934_vm1, %v7209_v35  ;;  %6169 = vmatprep.mubr.msk.f32.mxu0 %vm934_vm1, %v7483_v25  ;;  %v7501_v35 = vld [vmem:[#allocation2 + $0xef] sm:$0xff] }
 0x149   : > { %6316 = vmatprep.mubr.msk.f32.mxu1 %vm934_vm1, %v7215_v44  ;;  %v1899_v44 = vld [vmem:[#allocation2 + $0x9] sm:$0xff] }
 0x14b   : > { %6170 = vmatmul.mubr.msk.f32.gmra.mrb[44].mxu0 %vm934_vm1, %v7489_v27 }
 0x14c   : > { %6317 = vmatmul.mubr.msk.f32.gmra.mrb[28].mxu1 %vm934_vm1, %v7221_v46  ;;  %6172 = vmatprep.mubr.msk.f32.mxu0 %vm934_vm1, %v7495_v33  ;;  %v7571_v46 = vld [vmem:[#allocation2 + $0x208] sm:$0xff] }
 0x14d   : > { %6319 = vmatprep.mubr.msk.f32.mxu1 %vm934_vm1, %v7227_v52  ;;  %v1900_v52 = vld [vmem:[#allocation2 + $0x11] sm:$0xff] }
 0x14f   : > { %6173 = vmatmul.mubr.msk.f32.gmra.mrb[46].mxu0 %vm934_vm1, %v7501_v35 }
 0x150   : > { %6320 = vmatmul.mubr.msk.f32.gmra.mrb[30].mxu1 %vm934_vm1, %v7233_v54  ;;  %6175 = vmatprep.mubr.msk.f32.mxu0 %vm934_vm1, %v7241_v62  ;;  %v7576_v54 = vld [vmem:[#allocation2 + $0x210] sm:$0xff] }
 0x151   : > { %6322 = vmatprep.mubr.msk.f32.mxu1 %vm934_vm1, %v7239_v61  ;;  %v1901_v61 = vld [vmem:[#allocation2 + $0x29] sm:$0xff] }
 0x153   : > { %6176 = vmatmul.mubr.msk.f32.gmra.mrb[48].mxu0 %vm934_vm1, %v7243_v63 }
 0x154   : > { %6323 = vmatmul.mubr.msk.f32.gmra.mrb[0].mxu1 %vm934_vm1, %v7251_v2  ;;  %6178 = vmatprep.mubr.msk.f32.mxu0 %vm934_vm1, %v7268_v13 }
 0x155   : > { %6325 = vmatprep.mubr.msk.f32.mxu1 %vm934_vm1, %v7266_v12 }
 0x157   : > { %6179 = vmatmul.mubr.msk.f32.gmra.mrb[50].mxu0 %vm934_vm1, %v7270_v14 }
 0x158   : > { %6326 = vmatmul.mubr.msk.f32.gmra.mrb[2].mxu1 %vm934_vm1, %v7280_v40  ;;  %6181 = vmatprep.mubr.msk.f32.mxu0 %vm934_vm1, %v7290_v24 }
 0x159   : > { %6328 = vmatprep.mubr.msk.f32.mxu1 %vm934_vm1, %v7288_v23 }
 0x15b   : > { %6182 = vmatmul.mubr.msk.f32.gmra.mrb[52].mxu0 %vm934_vm1, %v7292_v26 }
 0x15c   : > { %6329 = vmatmul.mubr.msk.f32.gmra.mrb[4].mxu1 %vm934_vm1, %v7300_v29  ;;  %6184 = vmatprep.mubr.msk.f32.mxu0 %vm934_vm1, %v7310_v38 }
 0x15d   : > { %6331 = vmatprep.mubr.msk.f32.mxu1 %vm934_vm1, %v7308_v37 }
 0x15f   : > { %6185 = vmatmul.mubr.msk.f32.gmra.mrb[54].mxu0 %vm934_vm1, %v7312_v41 }
 0x160   : > { %6332 = vmatmul.mubr.msk.f32.gmra.mrb[6].mxu1 %vm934_vm1, %v7320_v45  ;;  %6187 = vmatprep.mubr.msk.f32.mxu0 %vm934_vm1, %v7330_v55 }
 0x161   : > { %6334 = vmatprep.mubr.msk.f32.mxu1 %vm934_vm1, %v7328_v53 }
 0x163   : > { %6188 = vmatmul.mubr.msk.f32.gmra.mrb[56].mxu0 %vm934_vm1, %v7332_v57 }
 0x164   : > { %6335 = vmatmul.mubr.msk.f32.gmra.mrb[8].mxu1 %vm934_vm1, %v7340_v59  ;;  %6190 = vmatprep.mubr.msk.f32.mxu0 %vm934_vm1, %v7350_v10 }
 0x165   : > { %6337 = vmatprep.mubr.msk.f32.mxu1 %vm934_vm1, %v7348_v8 }
 0x167   : > { %6191 = vmatmul.mubr.msk.f32.gmra.mrb[58].mxu0 %vm934_vm1, %v7352_v15 }
 0x168   : > { %6338 = vmatmul.mubr.msk.f32.gmra.mrb[10].mxu1 %vm934_vm1, %v7360_v18  ;;  %6193 = vmatprep.mubr.msk.f32.mxu0 %vm934_vm1, %v7369_v42 }
 0x169   : > { %6340 = vmatprep.mubr.msk.f32.mxu1 %vm934_vm1, %v7367_v22 }
 0x16b   : > { %6194 = vmatmul.mubr.msk.f32.gmra.mrb[60].mxu0 %vm934_vm1, %v7371_v28 }
 0x16c   : > { %6341 = vmatmul.mubr.msk.f32.gmra.mrb[12].mxu1 %vm934_vm1, %v7378_v30  ;;  %6196 = vmatprep.mubr.msk.f32.mxu0 %vm934_vm1, %v7386_v34 }
 0x16d   : > { %6343 = vmatprep.mubr.msk.f32.mxu1 %vm934_vm1, %v7384_v32 }
 0x16f   : > { %6197 = vmatmul.mubr.msk.f32.gmra.mrb[62].mxu0 %vm934_vm1, %v7388_v36 }
 0x170   : > { %6344 = vmatmul.mubr.msk.f32.gmra.mrb[14].mxu1 %vm934_vm1, %v7394_v43  ;;  %6201 = vmatprep.mubr.msk.f32.mxu0 %vm934_vm1, %v1899_v44  ;;  %v7656_v44 = vld [vmem:[#allocation2 + $0xe9] sm:$0xff] }
 0x171   : > { %6346 = vmatprep.mubr.msk.f32.mxu1 %vm934_vm1, %v7571_v46  ;;  %8283 = vst [vmem:[#allocation3_spill] sm:$0xff] %v7656_v44 }
 0x173   : > { %6202 = vmatmul.mubr.msk.f32.vlgmr.msra.gmra.mrb[32].mxu0 %vm934_vm1, %v1900_v52  ;;  %v7662_v52 = vld [vmem:[#allocation2 + $0xf1] sm:$0xff] }
 0x174   : > { %6347 = vmatmul.mubr.msk.f32.gmra.mrb[16].mxu1 %vm934_vm1, %v7576_v54  ;;  %6204 = vmatprep.mubr.msk.f32.mxu0 %vm934_vm1, %v1901_v61  ;;  %8284 = vst [vmem:[#allocation4_spill] sm:$0xff] %v7662_v52 }
 0x175   : > { %6351 = vmatprep.mubr.msk.f32.mxu1 %vm934_vm1, %v1901_v61  ;;  %6250 = vmatpush3.msk.msra.mxu0 %vm1346_vm3, %v7113_v39  ;;  %v7602_v39 = vld [vmem:[#allocation2 + $0x51] sm:$0xff]  ;;  %v7668_v61 = vld [vmem:[#allocation2 + $0x109] sm:$0xff] }
 0x176   : > { %8285 = vst [vmem:[#allocation5_spill] sm:$0xff] %v7668_v61 }
 0x177   : > { %6205 = vmatmul.mubr.msk.f32.gmra.mrb[34].mxu0 %vm934_vm1, %v1902_v60 }
 0x178   : > { %6352 = vmatmul.mubr.msk.f32.vlgmr.msra.gmra.mrb[18].mxu1 %vm934_vm1, %v1902_v60  ;;  %6207 = vmatprep.mubr.msk.f32.mxu0 %vm934_vm1, %v7592_v5  ;;  %v7674_v60 = vld [vmem:[#allocation2 + $0x111] sm:$0xff] }
 0x179   : > { %6400 = vmatpush3.msk.msra.mxu1 %vm1346_vm3, %v7423_v58  ;;  %6354 = vmatprep.mubr.msk.f32.mxu1 %vm934_vm1, %v7592_v5  ;;  %v7650_v58 = vld [vmem:[#allocation2 + $0xd1] sm:$0xff]  ;;  %8286 = vst [vmem:[#allocation6_spill] sm:$0xff] %v7674_v60 }
 0x17a   : > { %6449 = vmatprep.subr.msk.mxu1 %vm1346_vm3, %v7588_v0 }
 0x17b   : > { %6208 = vmatmul.mubr.msk.f32.gmra.mrb[36].mxu0 %vm934_vm1, %v7602_v39 }
 0x17c   : > { %6355 = vmatmul.mubr.msk.f32.gmra.mrb[20].mxu1 %vm934_vm1, %v7602_v39  ;;  %6210 = vmatprep.mubr.msk.f32.mxu0 %vm934_vm1, %v7608_v6 }
 0x17d   : > { %6357 = vmatprep.mubr.msk.f32.mxu1 %vm934_vm1, %v7608_v6 }
 0x17f   : > { %6211 = vmatmul.mubr.msk.f32.gmra.mrb[38].mxu0 %vm934_vm1, %v7614_v7 }
 0x180   : > { %6358 = vmatmul.mubr.msk.f32.gmra.mrb[22].mxu1 %vm934_vm1, %v7614_v7  ;;  %6213 = vmatprep.mubr.msk.f32.mxu0 %vm934_vm1, %v7620_v16 }
 0x181   : > { %6360 = vmatprep.mubr.msk.f32.mxu1 %vm934_vm1, %v7620_v16 }
 0x183   : > { %6214 = vmatmul.mubr.msk.f32.gmra.mrb[40].mxu0 %vm934_vm1, %v7626_v20 }
 0x184   : > { %6361 = vmatmul.mubr.msk.f32.gmra.mrb[24].mxu1 %vm934_vm1, %v7626_v20  ;;  %6216 = vmatprep.mubr.msk.f32.mxu0 %vm934_vm1, %v7632_v21 }
 0x185   : > { %6363 = vmatprep.mubr.msk.f32.mxu1 %vm934_vm1, %v7632_v21 }
 0x187   : > { %6217 = vmatmul.mubr.msk.f32.gmra.mrb[42].mxu0 %vm934_vm1, %v7638_v31 }
 0x188   : > { %6364 = vmatmul.mubr.msk.f32.gmra.mrb[26].mxu1 %vm934_vm1, %v7638_v31  ;;  %6219 = vmatprep.mubr.msk.f32.mxu0 %vm934_vm1, %v7644_v47 }
 0x189   : > { %6366 = vmatprep.mubr.msk.f32.mxu1 %vm934_vm1, %v7644_v47 }
 0x18b   : > { %6220 = vmatmul.mubr.msk.f32.gmra.mrb[44].mxu0 %vm934_vm1, %v7650_v58 }
 0x18c   : > { %6367 = vmatmul.mubr.msk.f32.gmra.mrb[28].mxu1 %vm934_vm1, %v7650_v58  ;;  %6222 = vmatprep.mubr.msk.f32.mxu0 %vm934_vm1, %v7656_v44 }
 0x18d   : > { %6369 = vmatprep.mubr.msk.f32.mxu1 %vm934_vm1, %v7656_v44  ;;  %v7680_v44 = vld [vmem:[#allocation2 + $0x129] sm:$0xff] }
 0x18e   : > { %8287 = vst [vmem:[#allocation7_spill] sm:$0xff] %v7680_v44 }
 0x18f   : > { %6223 = vmatmul.mubr.msk.f32.gmra.mrb[46].mxu0 %vm934_vm1, %v7662_v52 }
 0x190   : > { %6370 = vmatmul.mubr.msk.f32.gmra.mrb[30].mxu1 %vm934_vm1, %v7662_v52  ;;  %6225 = vmatprep.mubr.msk.f32.mxu0 %vm934_vm1, %v7668_v61  ;;  %v7686_v52 = vld [vmem:[#allocation2 + $0x131] sm:$0xff] }
 0x191   : > { %6372 = vmatprep.mubr.msk.f32.mxu1 %vm934_vm1, %v7668_v61  ;;  %8288 = vst [vmem:[#allocation8_spill] sm:$0xff] %v7686_v52  ;;  %v7692_v61 = vld [vmem:[#allocation2 + $0x149] sm:$0xff] }
 0x192   : > { %8289 = vst [vmem:[#allocation9_spill] sm:$0xff] %v7692_v61 }
 0x193   : > { %6226 = vmatmul.mubr.msk.f32.gmra.mrb[48].mxu0 %vm934_vm1, %v7674_v60 }
 0x194   : > { %6373 = vmatmul.mubr.msk.f32.gmra.mrb[0].mxu1 %vm934_vm1, %v7674_v60  ;;  %6228 = vmatprep.mubr.msk.f32.mxu0 %vm934_vm1, %v7680_v44  ;;  %v7698_v60 = vld [vmem:[#allocation2 + $0x151] sm:$0xff] }
 0x195   : > { %6375 = vmatprep.mubr.msk.f32.mxu1 %vm934_vm1, %v7680_v44  ;;  %8290 = vst [vmem:[#allocation10_spill] sm:$0xff] %v7698_v60  ;;  %v7704_v44 = vld [vmem:[#allocation2 + $0x169] sm:$0xff] }
 0x196   : > { %8291 = vst [vmem:[#allocation11_spill] sm:$0xff] %v7704_v44 }
 0x197   : > { %6229 = vmatmul.mubr.msk.f32.gmra.mrb[50].mxu0 %vm934_vm1, %v7686_v52 }
 0x198   : > { %6376 = vmatmul.mubr.msk.f32.gmra.mrb[2].mxu1 %vm934_vm1, %v7686_v52  ;;  %6231 = vmatprep.mubr.msk.f32.mxu0 %vm934_vm1, %v7692_v61  ;;  %v7710_v52 = vld [vmem:[#allocation2 + $0x171] sm:$0xff] }
 0x199   : > { %6378 = vmatprep.mubr.msk.f32.mxu1 %vm934_vm1, %v7692_v61  ;;  %8292 = vst [vmem:[#allocation12_spill] sm:$0xff] %v7710_v52  ;;  %v7716_v61 = vld [vmem:[#allocation2 + $0x189] sm:$0xff] }
 0x19a   : > { %8293 = vst [vmem:[#allocation13_spill] sm:$0xff] %v7716_v61 }
 0x19b   : > { %6232 = vmatmul.mubr.msk.f32.gmra.mrb[52].mxu0 %vm934_vm1, %v7698_v60 }
 0x19c   : > { %6379 = vmatmul.mubr.msk.f32.gmra.mrb[4].mxu1 %vm934_vm1, %v7698_v60  ;;  %6234 = vmatprep.mubr.msk.f32.mxu0 %vm934_vm1, %v7704_v44  ;;  %v7722_v60 = vld [vmem:[#allocation2 + $0x191] sm:$0xff] }
 0x19d   : > { %6381 = vmatprep.mubr.msk.f32.mxu1 %vm934_vm1, %v7704_v44  ;;  %8294 = vst [vmem:[#allocation14_spill] sm:$0xff] %v7722_v60  ;;  %v7728_v44 = vld [vmem:[#allocation2 + $0x1a9] sm:$0xff] }
 0x19e   : > { %8295 = vst [vmem:[#allocation15_spill] sm:$0xff] %v7728_v44 }
 0x19f   : > { %6235 = vmatmul.mubr.msk.f32.gmra.mrb[54].mxu0 %vm934_vm1, %v7710_v52 }
 0x1a0   : > { %6382 = vmatmul.mubr.msk.f32.gmra.mrb[6].mxu1 %vm934_vm1, %v7710_v52  ;;  %6237 = vmatprep.mubr.msk.f32.mxu0 %vm934_vm1, %v7716_v61  ;;  %v7734_v52 = vld [vmem:[#allocation2 + $0x1b1] sm:$0xff] }
 0x1a1   : > { %6384 = vmatprep.mubr.msk.f32.mxu1 %vm934_vm1, %v7716_v61  ;;  %8296 = vst [vmem:[#allocation16_spill] sm:$0xff] %v7734_v52  ;;  %v7740_v61 = vld [vmem:[#allocation2 + $0x1c9] sm:$0xff] }
 0x1a2   : > { %8297 = vst [vmem:[#allocation17_spill] sm:$0xff] %v7740_v61 }
 0x1a3   : > { %6238 = vmatmul.mubr.msk.f32.gmra.mrb[56].mxu0 %vm934_vm1, %v7722_v60 }
 0x1a4   : > { %6385 = vmatmul.mubr.msk.f32.gmra.mrb[8].mxu1 %vm934_vm1, %v7722_v60  ;;  %6240 = vmatprep.mubr.msk.f32.mxu0 %vm934_vm1, %v7728_v44  ;;  %v7746_v60 = vld [vmem:[#allocation2 + $0x1d1] sm:$0xff] }
 0x1a5   : > { %6387 = vmatprep.mubr.msk.f32.mxu1 %vm934_vm1, %v7728_v44  ;;  %8298 = vst [vmem:[#allocation18_spill] sm:$0xff] %v7746_v60  ;;  %v7752_v44 = vld [vmem:[#allocation2 + $0x1e9] sm:$0xff] }
 0x1a7   : > { %6241 = vmatmul.mubr.msk.f32.gmra.mrb[58].mxu0 %vm934_vm1, %v7734_v52 }
 0x1a8   : > { %6388 = vmatmul.mubr.msk.f32.gmra.mrb[10].mxu1 %vm934_vm1, %v7734_v52  ;;  %6243 = vmatprep.mubr.msk.f32.mxu0 %vm934_vm1, %v7740_v61  ;;  %v7758_v52 = vld [vmem:[#allocation2 + $0x1f1] sm:$0xff] }
 0x1a9   : > { %6390 = vmatprep.mubr.msk.f32.mxu1 %vm934_vm1, %v7740_v61  ;;  %v7764_v61 = vld [vmem:[#allocation2 + $0x209] sm:$0xff] }
 0x1ab   : > { %6244 = vmatmul.mubr.msk.f32.gmra.mrb[60].mxu0 %vm934_vm1, %v7746_v60 }
 0x1ac   : > { %6391 = vmatmul.mubr.msk.f32.gmra.mrb[12].mxu1 %vm934_vm1, %v7746_v60  ;;  %6246 = vmatprep.mubr.msk.f32.mxu0 %vm934_vm1, %v7752_v44  ;;  %v7770_v60 = vld [vmem:[#allocation2 + $0x211] sm:$0xff] }
 0x1ad   : > { %6393 = vmatprep.mubr.msk.f32.mxu1 %vm934_vm1, %v7752_v44 }
 0x1af   : > { %6247 = vmatmul.mubr.msk.f32.gmra.mrb[62].mxu0 %vm934_vm1, %v7758_v52 }
 0x1b0   : > { %6394 = vmatmul.mubr.msk.f32.gmra.mrb[14].mxu1 %vm934_vm1, %v7758_v52  ;;  %6251 = vmatprep.mubr.msk.f32.mxu0 %vm934_vm1, %v7410_v50  ;;  %v4266_v50 = vld [vmem:[%s8262_s5 + $0x20] sm:$0xf] }
 0x1b1   : > { %6396 = vmatprep.mubr.msk.f32.mxu1 %vm934_vm1, %v7764_v61 }
 0x1b3   : > { %6252 = vmatmul.mubr.msk.f32.vlgmr.msra.gmra.mrb[32].mxu0 %vm934_vm1, %v7418_v51  ;;  %v8312_v51 = vld [vmem:[#allocation16_spill] sm:$0xff] }
 0x1b4   : > { %6397 = vmatmul.mubr.msk.f32.gmra.mrb[16].mxu1 %vm934_vm1, %v7770_v60  ;;  %6254 = vmatprep.mubr.msk.f32.mxu0 %vm934_vm1, %v7431_v1 }
 0x1b5   : > { %6401 = vmatprep.mubr.msk.f32.mxu1 %vm934_vm1, %v7431_v1  ;;  %v8313_v1 = vld [vmem:[#allocation17_spill] sm:$0xff] }
 0x1b7   : > { %6255 = vmatmul.mubr.msk.f32.gmra.mrb[34].mxu0 %vm934_vm1, %v7441_v56 }
 0x1b8   : > { %6402 = vmatmul.mubr.msk.f32.vlgmr.msra.gmra.mrb[18].mxu1 %vm934_vm1, %v7441_v56  ;;  %6257 = vmatprep.mubr.msk.f32.mxu0 %vm934_vm1, %v7447_v3 }
 0x1b9   : > { %6450 = vmatpush3.msk.msra.mxu1 %vm1346_vm3, %v7588_v0  ;;  %6404 = vmatprep.mubr.msk.f32.mxu1 %vm934_vm1, %v7447_v3 }
 0x1ba   : > { %6499 = vmatprep.subr.msk.mxu1 %vm1346_vm3, %v4266_v50 }
 0x1bb   : > { %6258 = vmatmul.mubr.msk.f32.gmra.mrb[36].mxu0 %vm934_vm1, %v7453_v9 }
 0x1bc   : > { %6405 = vmatmul.mubr.msk.f32.gmra.mrb[20].mxu1 %vm934_vm1, %v7453_v9  ;;  %6260 = vmatprep.mubr.msk.f32.mxu0 %vm934_vm1, %v7459_v4  ;;  %v8314_v9 = vld [vmem:[#allocation18_spill] sm:$0xff] }
 0x1bd   : > { %6407 = vmatprep.mubr.msk.f32.mxu1 %vm934_vm1, %v7459_v4 }
 0x1bf   : > { %6261 = vmatmul.mubr.msk.f32.gmra.mrb[38].mxu0 %vm934_vm1, %v7465_v11 }
 0x1c0   : > { %6408 = vmatmul.mubr.msk.f32.gmra.mrb[22].mxu1 %vm934_vm1, %v7465_v11  ;;  %6263 = vmatprep.mubr.msk.f32.mxu0 %vm934_vm1, %v7471_v17 }
 0x1c1   : > { %6410 = vmatprep.mubr.msk.f32.mxu1 %vm934_vm1, %v7471_v17  ;;  %v4264_v17 = vld [vmem:[#allocation2 + $0x229] sm:$0xff] }
 0x1c3   : > { %6264 = vmatmul.mubr.msk.f32.gmra.mrb[40].mxu0 %vm934_vm1, %v7477_v19 }
 0x1c4   : > { %6411 = vmatmul.mubr.msk.f32.gmra.mrb[24].mxu1 %vm934_vm1, %v7477_v19  ;;  %6266 = vmatprep.mubr.msk.f32.mxu0 %vm934_vm1, %v7483_v25 }
 0x1c5   : > { %6413 = vmatprep.mubr.msk.f32.mxu1 %vm934_vm1, %v7483_v25 }
 0x1c7   : > { %6267 = vmatmul.mubr.msk.f32.gmra.mrb[42].mxu0 %vm934_vm1, %v7489_v27 }
 0x1c8   : > { %6414 = vmatmul.mubr.msk.f32.gmra.mrb[26].mxu1 %vm934_vm1, %v7489_v27  ;;  %6269 = vmatprep.mubr.msk.f32.mxu0 %vm934_vm1, %v7495_v33  ;;  %v4265_v27 = vld [vmem:[#allocation2 + $0x231] sm:$0xff] }
 0x1c9   : > { %6416 = vmatprep.mubr.msk.f32.mxu1 %vm934_vm1, %v7495_v33 }
 0x1cb   : > { %6270 = vmatmul.mubr.msk.f32.gmra.mrb[44].mxu0 %vm934_vm1, %v7501_v35 }
 0x1cc   : > { %6417 = vmatmul.mubr.msk.f32.gmra.mrb[28].mxu1 %vm934_vm1, %v7501_v35 }
 0x1cd   : > { %6419 = vmatprep.mubr.msk.f32.mxu1 %vm934_vm1, %v7241_v62  ;;  %v3486_v62 = vld [vmem:[#allocation2 + $0x227] sm:$0xff] }
 0x1d0   : > { %6420 = vmatmul.mubr.msk.f32.gmra.mrb[30].mxu1 %vm934_vm1, %v7243_v63  ;;  %v3487_v63 = vld [vmem:[#allocation2 + $0x22f] sm:$0xff] }
 0x1d1   : > { %6422 = vmatprep.mubr.msk.f32.mxu1 %vm934_vm1, %v7268_v13  ;;  %v3845_v13 = vld [vmem:[#allocation2 + $0x48] sm:$0xff] }
 0x1d4   : > { %6423 = vmatmul.mubr.msk.f32.gmra.mrb[0].mxu1 %vm934_vm1, %v7270_v14  ;;  %v3846_v14 = vld [vmem:[#allocation2 + $0x50] sm:$0xff] }
 0x1d5   : > { %6425 = vmatprep.mubr.msk.f32.mxu1 %vm934_vm1, %v7290_v24  ;;  %v3847_v24 = vld [vmem:[#allocation2 + $0x68] sm:$0xff] }
 0x1d8   : > { %6426 = vmatmul.mubr.msk.f32.gmra.mrb[2].mxu1 %vm934_vm1, %v7292_v26  ;;  %v3848_v26 = vld [vmem:[#allocation2 + $0x70] sm:$0xff] }
 0x1d9   : > { %6428 = vmatprep.mubr.msk.f32.mxu1 %vm934_vm1, %v7310_v38  ;;  %v3849_v38 = vld [vmem:[#allocation2 + $0x88] sm:$0xff] }
 0x1dc   : > { %6429 = vmatmul.mubr.msk.f32.gmra.mrb[4].mxu1 %vm934_vm1, %v7312_v41  ;;  %v3850_v41 = vld [vmem:[#allocation2 + $0x90] sm:$0xff] }
 0x1dd   : > { %6431 = vmatprep.mubr.msk.f32.mxu1 %vm934_vm1, %v7330_v55  ;;  %v3851_v55 = vld [vmem:[#allocation2 + $0xa8] sm:$0xff] }
 0x1e0   : > { %6432 = vmatmul.mubr.msk.f32.gmra.mrb[6].mxu1 %vm934_vm1, %v7332_v57  ;;  %v3852_v57 = vld [vmem:[#allocation2 + $0xb0] sm:$0xff] }
 0x1e1   : > { %6434 = vmatprep.mubr.msk.f32.mxu1 %vm934_vm1, %v7350_v10  ;;  %v3853_v10 = vld [vmem:[#allocation2 + $0xc8] sm:$0xff] }
 0x1e4   : > { %6435 = vmatmul.mubr.msk.f32.gmra.mrb[8].mxu1 %vm934_vm1, %v7352_v15  ;;  %v3854_v15 = vld [vmem:[#allocation2 + $0xd0] sm:$0xff] }
 0x1e5   : > { %6437 = vmatprep.mubr.msk.f32.mxu1 %vm934_vm1, %v7369_v42  ;;  %v3855_v42 = vld [vmem:[#allocation2 + $0xe8] sm:$0xff] }
 0x1e8   : > { %6438 = vmatmul.mubr.msk.f32.gmra.mrb[10].mxu1 %vm934_vm1, %v7371_v28  ;;  %v3856_v28 = vld [vmem:[#allocation2 + $0xf0] sm:$0xff] }
 0x1e9   : > { %6440 = vmatprep.mubr.msk.f32.mxu1 %vm934_vm1, %v7386_v34  ;;  %v3857_v34 = vld [vmem:[#allocation2 + $0x108] sm:$0xff] }
 0x1ec   : > { %6441 = vmatmul.mubr.msk.f32.gmra.mrb[12].mxu1 %vm934_vm1, %v7388_v36  ;;  %v8310_v36 = vld [vmem:[#allocation14_spill] sm:$0xff] }
 0x1ed   : > { %6443 = vmatprep.mubr.msk.f32.mxu1 %vm934_vm1, %v7401_v48 }
 0x1f0   : > { %6444 = vmatmul.mubr.msk.f32.gmra.mrb[14].mxu1 %vm934_vm1, %v7403_v49 }
 0x1f1   : > { %6446 = vmatprep.mubr.msk.f32.mxu1 %vm934_vm1, %v3486_v62 }
 0x1f4   : > { %6447 = vmatmul.mubr.msk.f32.gmra.mrb[16].mxu1 %vm934_vm1, %v3487_v63 }
 0x1f5   : > { %6451 = vmatprep.mubr.msk.f32.mxu1 %vm934_vm1, %v3845_v13 }
 0x1f8   : > { %6452 = vmatmul.mubr.msk.f32.vlgmr.msra.gmra.mrb[18].mxu1 %vm934_vm1, %v3846_v14 }
 0x1f9   : > { %6500 = vmatpush3.msk.msra.mxu1 %vm1346_vm3, %v4266_v50  ;;  %6454 = vmatprep.mubr.msk.f32.mxu1 %vm934_vm1, %v3847_v24 }
 0x1fc   : > { %6455 = vmatmul.mubr.msk.f32.gmra.mrb[20].mxu1 %vm934_vm1, %v3848_v26  ;;  %v8024_v26 = vld [vmem:[%s8263_s6] ss:$0 sm:$0xff] }
 0x1fd   : > { %6457 = vmatprep.mubr.msk.f32.mxu1 %vm934_vm1, %v3849_v38 }
 0x200   : > { %6458 = vmatmul.mubr.msk.f32.gmra.mrb[22].mxu1 %vm934_vm1, %v3850_v41 }
 0x201   : > { %6460 = vmatprep.mubr.msk.f32.mxu1 %vm934_vm1, %v3851_v55 }
 0x204   : > { %6461 = vmatmul.mubr.msk.f32.gmra.mrb[24].mxu1 %vm934_vm1, %v3852_v57 }
 0x205   : > { %6463 = vmatprep.mubr.msk.f32.mxu1 %vm934_vm1, %v3853_v10 }
 0x208   : > { %6464 = vmatmul.mubr.msk.f32.gmra.mrb[26].mxu1 %vm934_vm1, %v3854_v15 }
 0x209   : > { %6466 = vmatprep.mubr.msk.f32.mxu1 %vm934_vm1, %v3855_v42 }
 0x20c   : > { %6467 = vmatmul.mubr.msk.f32.gmra.mrb[28].mxu1 %vm934_vm1, %v3856_v28 }
 0x20d   : > { %6469 = vmatprep.mubr.msk.f32.mxu1 %vm934_vm1, %v3857_v34 }
 0x210   : > { %6470 = vmatmul.mubr.msk.f32.gmra.mrb[30].mxu1 %vm934_vm1, %v7251_v2  ;;  %v4694_v2 = vld [vmem:[%s8264_s7] sm:$0xf] }
 0x211   : > { %6472 = vmatprep.mubr.msk.f32.mxu1 %vm934_vm1, %v7266_v12  ;;  %6549 = vmatprep.subr.msk.mxu0 %vm1346_vm3, %v4694_v2  ;;  %v3875_v12 = vld [vmem:[#allocation2 + $0x228] sm:$0xff] }
 0x212   : > { %6550 = vmatpush3.msk.msra.mxu0 %vm1346_vm3, %v4694_v2 }
 0x214   : > { %6473 = vmatmul.mubr.msk.f32.gmra.mrb[0].mxu1 %vm934_vm1, %v7280_v40  ;;  %v3876_v40 = vld [vmem:[#allocation2 + $0x230] sm:$0xff] }
 0x215   : > { %6475 = vmatprep.mubr.msk.f32.mxu1 %vm934_vm1, %v7288_v23  ;;  %v8299_v23 = vld [vmem:[#allocation3_spill] sm:$0xff] }
 0x218   : > { %6476 = vmatmul.mubr.msk.f32.gmra.mrb[2].mxu1 %vm934_vm1, %v7300_v29  ;;  %v8300_v29 = vld [vmem:[#allocation4_spill] sm:$0xff] }
 0x219   : > { %6478 = vmatprep.mubr.msk.f32.mxu1 %vm934_vm1, %v7308_v37  ;;  %v8301_v37 = vld [vmem:[#allocation5_spill] sm:$0xff] }
 0x21c   : > { %6479 = vmatmul.mubr.msk.f32.gmra.mrb[4].mxu1 %vm934_vm1, %v7320_v45  ;;  %v8302_v45 = vld [vmem:[#allocation6_spill] sm:$0xff] }
 0x21d   : > { %6481 = vmatprep.mubr.msk.f32.mxu1 %vm934_vm1, %v7328_v53  ;;  %v8303_v53 = vld [vmem:[#allocation7_spill] sm:$0xff] }
 0x220   : > { %6482 = vmatmul.mubr.msk.f32.gmra.mrb[6].mxu1 %vm934_vm1, %v7340_v59  ;;  %v8304_v59 = vld [vmem:[#allocation8_spill] sm:$0xff] }
 0x221   : > { %6484 = vmatprep.mubr.msk.f32.mxu1 %vm934_vm1, %v7348_v8  ;;  %v8305_v8 = vld [vmem:[#allocation9_spill] sm:$0xff] }
 0x224   : > { %6485 = vmatmul.mubr.msk.f32.gmra.mrb[8].mxu1 %vm934_vm1, %v7360_v18  ;;  %v8306_v18 = vld [vmem:[#allocation10_spill] sm:$0xff] }
 0x225   : > { %6487 = vmatprep.mubr.msk.f32.mxu1 %vm934_vm1, %v7367_v22  ;;  %v8307_v22 = vld [vmem:[#allocation11_spill] sm:$0xff] }
 0x228   : > { %6488 = vmatmul.mubr.msk.f32.gmra.mrb[10].mxu1 %vm934_vm1, %v7378_v30  ;;  %v8308_v30 = vld [vmem:[#allocation12_spill] sm:$0xff] }
 0x229   : > { %6490 = vmatprep.mubr.msk.f32.mxu1 %vm934_vm1, %v7384_v32  ;;  %v8309_v32 = vld [vmem:[#allocation13_spill] sm:$0xff] }
 0x22c   : > { %6491 = vmatmul.mubr.msk.f32.gmra.mrb[12].mxu1 %vm934_vm1, %v7394_v43  ;;  %v8311_v43 = vld [vmem:[#allocation15_spill] sm:$0xff] }
 0x22d   : > { %6493 = vmatprep.mubr.msk.f32.mxu1 %vm934_vm1, %v7571_v46 }
 0x230   : > { %6494 = vmatmul.mubr.msk.f32.gmra.mrb[14].mxu1 %vm934_vm1, %v7576_v54 }
 0x231   : > { %6496 = vmatprep.mubr.msk.f32.mxu1 %vm934_vm1, %v3875_v12 }
 0x234   : > { %6497 = vmatmul.mubr.msk.f32.gmra.mrb[16].mxu1 %vm934_vm1, %v3876_v40 }
 0x235   : > { %6501 = vmatprep.mubr.msk.f32.mxu1 %vm934_vm1, %v7592_v5 }
 0x238   : > { %6502 = vmatmul.mubr.msk.f32.vlgmr.msra.gmra.mrb[18].mxu1 %vm934_vm1, %v7602_v39 }
 0x239   : > { %6504 = vmatprep.mubr.msk.f32.mxu1 %vm934_vm1, %v7608_v6 }
 0x23c   : > { %6505 = vmatmul.mubr.msk.f32.gmra.mrb[20].mxu1 %vm934_vm1, %v7614_v7 }
 0x23d   : > { %6507 = vmatprep.mubr.msk.f32.mxu1 %vm934_vm1, %v7620_v16 }
 0x240   : > { %6508 = vmatmul.mubr.msk.f32.gmra.mrb[22].mxu1 %vm934_vm1, %v7626_v20 }
 0x241   : > { %6510 = vmatprep.mubr.msk.f32.mxu1 %vm934_vm1, %v7632_v21 }
 0x244   : > { %6511 = vmatmul.mubr.msk.f32.gmra.mrb[24].mxu1 %vm934_vm1, %v7638_v31 }
 0x245   : > { %6513 = vmatprep.mubr.msk.f32.mxu1 %vm934_vm1, %v7644_v47 }
 0x248   : > { %6514 = vmatmul.mubr.msk.f32.gmra.mrb[26].mxu1 %vm934_vm1, %v7650_v58 }
 0x249   : > { %6516 = vmatprep.mubr.msk.f32.mxu1 %vm934_vm1, %v8299_v23 }
 0x24c   : > { %6517 = vmatmul.mubr.msk.f32.gmra.mrb[28].mxu1 %vm934_vm1, %v8300_v29 }
 0x24d   : > { %6519 = vmatprep.mubr.msk.f32.mxu1 %vm934_vm1, %v8301_v37 }
 0x250   : > { %6520 = vmatmul.mubr.msk.f32.gmra.mrb[30].mxu1 %vm934_vm1, %v8302_v45 }
 0x251   : > { %6522 = vmatprep.mubr.msk.f32.mxu1 %vm934_vm1, %v8303_v53 }
 0x254   : > { %6523 = vmatmul.mubr.msk.f32.gmra.mrb[0].mxu1 %vm934_vm1, %v8304_v59 }
 0x255   : > { %6525 = vmatprep.mubr.msk.f32.mxu1 %vm934_vm1, %v8305_v8 }
 0x258   : > { %6526 = vmatmul.mubr.msk.f32.gmra.mrb[2].mxu1 %vm934_vm1, %v8306_v18 }
 0x259   : > { %6528 = vmatprep.mubr.msk.f32.mxu1 %vm934_vm1, %v8307_v22 }
 0x25c   : > { %6529 = vmatmul.mubr.msk.f32.gmra.mrb[4].mxu1 %vm934_vm1, %v8308_v30 }
 0x25d   : > { %6531 = vmatprep.mubr.msk.f32.mxu1 %vm934_vm1, %v8309_v32 }
 0x260   : > { %6532 = vmatmul.mubr.msk.f32.gmra.mrb[6].mxu1 %vm934_vm1, %v8310_v36 }
 0x261   : > { %6534 = vmatprep.mubr.msk.f32.mxu1 %vm934_vm1, %v8311_v43 }
 0x262   : > { %v7969_v48 = vpop.f32.mrb[46].mxu0 }
 0x263   : > { %v7971_v49 = vpop.f32.mrb[47].mxu0 }
 0x264   : > { %6535 = vmatmul.mubr.msk.f32.gmra.mrb[8].mxu1 %vm934_vm1, %v8312_v51 }
 0x265   : > { %6537 = vmatprep.mubr.msk.f32.mxu1 %vm934_vm1, %v8313_v1 }
 0x266   : > { %v7977_v56 = vpop.f32.mrb[48].mxu0 }
 0x267   : > { %v7979_v3 = vpop.f32.mrb[49].mxu0 }
 0x268   : > { %6538 = vmatmul.mubr.msk.f32.gmra.mrb[10].mxu1 %vm934_vm1, %v8314_v9 }
 0x269   : > { %6540 = vmatprep.mubr.msk.f32.mxu1 %vm934_vm1, %v7752_v44 }
 0x26a   : > { %v7985_v4 = vpop.f32.mrb[50].mxu0 }
 0x26b   : > { %v7987_v11 = vpop.f32.mrb[51].mxu0 }
 0x26c   : > { %6541 = vmatmul.mubr.msk.f32.gmra.mrb[12].mxu1 %vm934_vm1, %v7758_v52 }
 0x26d   : > { %6543 = vmatprep.mubr.msk.f32.mxu1 %vm934_vm1, %v7764_v61 }
 0x26e   : > { %v7993_v19 = vpop.f32.mrb[52].mxu0 }
 0x26f   : > { %v7995_v25 = vpop.f32.mrb[53].mxu0 }
 0x270   : > { %6544 = vmatmul.mubr.msk.f32.gmra.mrb[14].mxu1 %vm934_vm1, %v7770_v60 }
 0x271   : > { %6546 = vmatprep.mubr.msk.f32.mxu1 %vm934_vm1, %v4264_v17 }
 0x272   : > { %v8000_v33 = vpop.f32.mrb[54].mxu0 }
 0x273   : > { %v8002_v35 = vpop.f32.mrb[55].mxu0 }
 0x274   : > { %6547 = vmatmul.mubr.msk.f32.gmra.mrb[16].mxu1 %vm934_vm1, %v4265_v27 }
 0x276   : > { %v8005_v46 = vpop.f32.mrb[56].mxu0 }
 0x277   : > { %v8007_v54 = vpop.f32.mrb[57].mxu0 }
 0x27a   : > { %v8009_v0 = vpop.f32.mrb[58].mxu0 }
 0x27b   : > { %v8011_v5 = vpop.f32.mrb[59].mxu0 }
 0x27e   : > { %v8013_v39 = vpop.f32.mrb[60].mxu0 }
 0x27f   : > { %v8015_v6 = vpop.f32.mrb[61].mxu0 }
 0x282   : > { %v8017_v7 = vpop.f32.mrb[62].mxu0 }
 0x283   : > { %v8019_v16 = vpop.f32.mrb[63].mxu0 }
 0x286   : > { %v6253_v20 = vpop.f32.mrb[32].mxu0 }
 0x287   : > { %v2486_v21 = vpop.f32.mrb[33].mxu0 }
 0x28a   : > { %v6256_v31 = vpop.f32.mrb[34].mxu0 }
 0x28b   : > { %v2496_v47 = vpop.f32.mrb[35].mxu0 }
 0x28e   : > { %v6259_v58 = vpop.f32.mrb[36].mxu0 }
 0x28f   : > { %v2506_v44 = vpop.f32.mrb[37].mxu0 }
 0x292   : > { %v6262_v52 = vpop.f32.mrb[38].mxu0 }
 0x293   : > { %v2516_v61 = vpop.f32.mrb[39].mxu0 }
 0x296   : > { %v6265_v60 = vpop.f32.mrb[40].mxu0 }
 0x297   : > { %v2526_v50 = vpop.f32.mrb[41].mxu0 }
 0x29a   : > { %v6268_v62 = vpop.f32.mrb[42].mxu0 }
 0x29b   : > { %v2536_v63 = vpop.f32.mrb[43].mxu0 }
 0x29e   : > { %v6271_v13 = vpop.f32.mrb[44].mxu0 }
 0x29f   : > { %v2546_v14 = vpop.f32.mrb[45].mxu0 }
 0x30b   : > { %v6503_v24 = vpop.f32.mrb[18].mxu1 }
 0x30c   : > { %v6605_v38 = vadd.f32 %v6503_v24, %v6253_v20  ;;  %v4432_v41 = vpop.f32.mrb[19].mxu1 }
 0x30d   : > { %v6606_v55 = vadd.f32 %v4432_v41, %v2486_v21 }
 0x30e   : > { %v4631_v57 = vadd.f32 %v6605_v38, %v8024_v26 }
 0x30f   : > { %v4630_v10 = vadd.f32 %v6606_v55, %v8024_v26  ;;  %v6506_v15 = vpop.f32.mrb[20].mxu1 }
 0x310   : > { %v6607_v42 = vadd.f32 %v6506_v15, %v6256_v31  ;;  %v4442_v28 = vpop.f32.mrb[21].mxu1  ;;  %v4663_v12 = vmax.f32 %v4631_v57, 0.0 }
 0x311   : > { %v4662_v34 = vmax.f32 %v4630_v10, 0.0  ;;  %v6608_v2 = vadd.f32 %v4442_v28, %v2496_v47 }
 0x312   : > { %v4633_v40 = vadd.f32 %v6607_v42, %v8024_v26 }
 0x313   : > { %v4632_v23 = vadd.f32 %v6608_v2, %v8024_v26  ;;  %v6509_v29 = vpop.f32.mrb[22].mxu1  ;;  %6551 = vmatprep.mubr.msk.f32.mxu0 %vm934_vm1, %v4662_v34 }
 0x314   : > { %v6609_v37 = vadd.f32 %v6509_v29, %v6259_v58  ;;  %v4452_v45 = vpop.f32.mrb[23].mxu1  ;;  %6552 = vmatmul.mubr.msk.f32.vlgmr.msra.gmra.mrb[64].mxu0 %vm934_vm1, %v4663_v12  ;;  %v4665_v8 = vmax.f32 %v4633_v40, 0.0 }
 0x315   : > { %v4664_v53 = vmax.f32 %v4632_v23, 0.0  ;;  %v6610_v59 = vadd.f32 %v4452_v45, %v2506_v44 }
 0x316   : > { %v4635_v18 = vadd.f32 %v6609_v37, %v8024_v26 }
 0x317   : > { %v4634_v22 = vadd.f32 %v6610_v59, %v8024_v26  ;;  %v6512_v30 = vpop.f32.mrb[24].mxu1  ;;  %6554 = vmatprep.mubr.msk.f32.mxu0 %vm934_vm1, %v4664_v53 }
 0x318   : > { %v6611_v32 = vadd.f32 %v6512_v30, %v6262_v52  ;;  %v4462_v36 = vpop.f32.mrb[25].mxu1  ;;  %6555 = vmatmul.mubr.msk.f32.gmra.mrb[66].mxu0 %vm934_vm1, %v4665_v8  ;;  %v4667_v1 = vmax.f32 %v4635_v18, 0.0 }
 0x319   : > { %v4666_v43 = vmax.f32 %v4634_v22, 0.0  ;;  %v6612_v51 = vadd.f32 %v4462_v36, %v2516_v61 }
 0x31a   : > { %v4637_v9 = vadd.f32 %v6611_v32, %v8024_v26 }
 0x31b   : > { %v4636_v17 = vadd.f32 %v6612_v51, %v8024_v26  ;;  %v6515_v27 = vpop.f32.mrb[26].mxu1  ;;  %6557 = vmatprep.mubr.msk.f32.mxu0 %vm934_vm1, %v4666_v43 }
 0x31c   : > { %v6613_v20 = vadd.f32 %v6515_v27, %v6265_v60  ;;  %v4472_v21 = vpop.f32.mrb[27].mxu1  ;;  %6558 = vmatmul.mubr.msk.f32.gmra.mrb[68].mxu0 %vm934_vm1, %v4667_v1  ;;  %v4669_v58 = vmax.f32 %v4637_v9, 0.0 }
 0x31d   : > { %v4668_v31 = vmax.f32 %v4636_v17, 0.0  ;;  %v6614_v47 = vadd.f32 %v4472_v21, %v2526_v50 }
 0x31e   : > { %v4639_v44 = vadd.f32 %v6613_v20, %v8024_v26 }
 0x31f   : > { %v4638_v52 = vadd.f32 %v6614_v47, %v8024_v26  ;;  %v6518_v61 = vpop.f32.mrb[28].mxu1  ;;  %6560 = vmatprep.mubr.msk.f32.mxu0 %vm934_vm1, %v4668_v31 }
 0x320   : > { %v6615_v24 = vadd.f32 %v6518_v61, %v6268_v62  ;;  %v4482_v38 = vpop.f32.mrb[29].mxu1  ;;  %6561 = vmatmul.mubr.msk.f32.gmra.mrb[70].mxu0 %vm934_vm1, %v4669_v58  ;;  %v4671_v60 = vmax.f32 %v4639_v44, 0.0 }
 0x321   : > { %v4670_v41 = vmax.f32 %v4638_v52, 0.0  ;;  %v6616_v55 = vadd.f32 %v4482_v38, %v2536_v63 }
 0x322   : > { %v4641_v57 = vadd.f32 %v6615_v24, %v8024_v26 }
 0x323   : > { %v4640_v10 = vadd.f32 %v6616_v55, %v8024_v26  ;;  %v6521_v50 = vpop.f32.mrb[30].mxu1  ;;  %6563 = vmatprep.mubr.msk.f32.mxu0 %vm934_vm1, %v4670_v41 }
 0x324   : > { %v6617_v15 = vadd.f32 %v6521_v50, %v6271_v13  ;;  %v4492_v42 = vpop.f32.mrb[31].mxu1  ;;  %6564 = vmatmul.mubr.msk.f32.gmra.mrb[72].mxu0 %vm934_vm1, %v4671_v60  ;;  %v4673_v62 = vmax.f32 %v4641_v57, 0.0 }
 0x325   : > { %v4672_v28 = vmax.f32 %v4640_v10, 0.0  ;;  %v6618_v34 = vadd.f32 %v4492_v42, %v2546_v14 }
 0x326   : > { %v4643_v2 = vadd.f32 %v6617_v15, %v8024_v26 }
 0x327   : > { %v4642_v12 = vadd.f32 %v6618_v34, %v8024_v26  ;;  %v6524_v63 = vpop.f32.mrb[0].mxu1  ;;  %6566 = vmatprep.mubr.msk.f32.mxu0 %vm934_vm1, %v4672_v28 }
 0x328   : > { %v6619_v40 = vadd.f32 %v6524_v63, %v7969_v48  ;;  %v4502_v23 = vpop.f32.mrb[1].mxu1  ;;  %6567 = vmatmul.mubr.msk.f32.gmra.mrb[74].mxu0 %vm934_vm1, %v4673_v62  ;;  %v4675_v37 = vmax.f32 %v4643_v2, 0.0 }
 0x329   : > { %v4674_v29 = vmax.f32 %v4642_v12, 0.0  ;;  %v6620_v13 = vadd.f32 %v4502_v23, %v7971_v49 }
 0x32a   : > { %v4645_v45 = vadd.f32 %v6619_v40, %v8024_v26 }
 0x32b   : > { %v4644_v14 = vadd.f32 %v6620_v13, %v8024_v26  ;;  %v6527_v53 = vpop.f32.mrb[2].mxu1  ;;  %6569 = vmatprep.mubr.msk.f32.mxu0 %vm934_vm1, %v4674_v29 }
 0x32c   : > { %v6621_v59 = vadd.f32 %v6527_v53, %v7977_v56  ;;  %v4512_v8 = vpop.f32.mrb[3].mxu1  ;;  %6570 = vmatmul.mubr.msk.f32.gmra.mrb[76].mxu0 %vm934_vm1, %v4675_v37  ;;  %v4677_v22 = vmax.f32 %v4645_v45, 0.0 }
 0x32d   : > { %v4676_v48 = vmax.f32 %v4644_v14, 0.0  ;;  %v6622_v18 = vadd.f32 %v4512_v8, %v7979_v3 }
 0x32e   : > { %v4647_v30 = vadd.f32 %v6621_v59, %v8024_v26 }
 0x32f   : > { %v4646_v49 = vadd.f32 %v6622_v18, %v8024_v26  ;;  %v6530_v32 = vpop.f32.mrb[4].mxu1  ;;  %6572 = vmatprep.mubr.msk.f32.mxu0 %vm934_vm1, %v4676_v48  ;;  %v4696_v18 = vld [vmem:[%s6993_s18 + $0x8] sm:$0xff] }
 0x330   : > { %v6623_v36 = vadd.f32 %v6530_v32, %v7985_v4  ;;  %v4522_v43 = vpop.f32.mrb[5].mxu1  ;;  %6573 = vmatmul.mubr.msk.f32.gmra.mrb[78].mxu0 %vm934_vm1, %v4677_v22  ;;  %v4679_v1 = vmax.f32 %v4647_v30, 0.0  ;;  %v4695_v30 = vld [vmem:[%s6993_s18] sm:$0xff] }
 0x331   : > { %v4678_v56 = vmax.f32 %v4646_v49, 0.0  ;;  %v6624_v51 = vadd.f32 %v4522_v43, %v7987_v11 }
 0x332   : > { %v4649_v9 = vadd.f32 %v6623_v36, %v8024_v26 }
 0x333   : > { %v4648_v3 = vadd.f32 %v6624_v51, %v8024_v26  ;;  %v6533_v17 = vpop.f32.mrb[6].mxu1  ;;  %6575 = vmatprep.mubr.msk.f32.mxu0 %vm934_vm1, %v4678_v56  ;;  %v4698_v56 = vld [vmem:[%s6993_s18 + $0x18] sm:$0xff] }
 0x334   : > { %v6625_v27 = vadd.f32 %v6533_v17, %v7993_v19  ;;  %v4532_v20 = vpop.f32.mrb[7].mxu1  ;;  %6576 = vmatmul.mubr.msk.f32.gmra.mrb[80].mxu0 %vm934_vm1, %v4679_v1  ;;  %v4681_v31 = vmax.f32 %v4649_v9, 0.0 }
 0x335   : > { %v4680_v4 = vmax.f32 %v4648_v3, 0.0  ;;  %v6626_v21 = vadd.f32 %v4532_v20, %v7995_v25  ;;  %v4697_v3 = vld [vmem:[%s6993_s18 + $0x10] sm:$0xff] }
 0x336   : > { %v4651_v47 = vadd.f32 %v6625_v27, %v8024_v26 }
 0x337   : > { %v4650_v11 = vadd.f32 %v6626_v21, %v8024_v26  ;;  %v6536_v58 = vpop.f32.mrb[8].mxu1  ;;  %6578 = vmatprep.mubr.msk.f32.mxu0 %vm934_vm1, %v4680_v4 }
 0x338   : > { %v6627_v44 = vadd.f32 %v6536_v58, %v8000_v33  ;;  %v4542_v52 = vpop.f32.mrb[9].mxu1  ;;  %6579 = vmatmul.mubr.msk.f32.gmra.mrb[82].mxu0 %vm934_vm1, %v4681_v31  ;;  %v4683_v24 = vmax.f32 %v4651_v47, 0.0  ;;  %v4700_v31 = vld [vmem:[%s6993_s18 + $0x28] sm:$0xff] }
 0x339   : > { %v4682_v19 = vmax.f32 %v4650_v11, 0.0  ;;  %v6628_v61 = vadd.f32 %v4542_v52, %v8002_v35 }
 0x33a   : > { %v4653_v38 = vadd.f32 %v6627_v44, %v8024_v26  ;;  %v4699_v44 = vld [vmem:[%s6993_s18 + $0x20] sm:$0xff] }
 0x33b   : > { %v4652_v25 = vadd.f32 %v6628_v61, %v8024_v26  ;;  %v6539_v41 = vpop.f32.mrb[10].mxu1  ;;  %6581 = vmatprep.mubr.msk.f32.mxu0 %vm934_vm1, %v4682_v19 }
 0x33c   : > { %v6629_v55 = vadd.f32 %v6539_v41, %v8005_v46  ;;  %v4552_v60 = vpop.f32.mrb[11].mxu1  ;;  %6582 = vmatmul.mubr.msk.f32.gmra.mrb[84].mxu0 %vm934_vm1, %v4683_v24  ;;  %v4685_v10 = vmax.f32 %v4653_v38, 0.0 }
 0x33d   : > { %v4684_v33 = vmax.f32 %v4652_v25, 0.0  ;;  %v6630_v57 = vadd.f32 %v4552_v60, %v8007_v54  ;;  %v4702_v25 = vld [vmem:[%s6993_s18 + $0x38] sm:$0xff] }
 0x33e   : > { %v4655_v50 = vadd.f32 %v6629_v55, %v8024_v26 }
 0x33f   : > { %v4654_v35 = vadd.f32 %v6630_v57, %v8024_v26  ;;  %v6542_v15 = vpop.f32.mrb[12].mxu1  ;;  %6584 = vmatprep.mubr.msk.f32.mxu0 %vm934_vm1, %v4684_v33  ;;  %v4701_v33 = vld [vmem:[%s6993_s18 + $0x30] sm:$0xff] }
 0x340   : > { %v6631_v42 = vadd.f32 %v6542_v15, %v8009_v0  ;;  %v4562_v28 = vpop.f32.mrb[13].mxu1  ;;  %6585 = vmatmul.mubr.msk.f32.gmra.mrb[86].mxu0 %vm934_vm1, %v4685_v10  ;;  %v4687_v62 = vmax.f32 %v4655_v50, 0.0 }
 0x341   : > { %v4686_v46 = vmax.f32 %v4654_v35, 0.0  ;;  %v6632_v34 = vadd.f32 %v4562_v28, %v8011_v5 }
 0x342   : > { %v4657_v2 = vadd.f32 %v6631_v42, %v8024_v26  ;;  %v4704_v42 = vld [vmem:[%s6993_s18 + $0x48] sm:$0xff] }
 0x343   : > { %v4656_v54 = vadd.f32 %v6632_v34, %v8024_v26  ;;  %v6545_v12 = vpop.f32.mrb[14].mxu1  ;;  %6587 = vmatprep.mubr.msk.f32.mxu0 %vm934_vm1, %v4686_v46 }
 0x344   : > { %v6633_v63 = vadd.f32 %v6545_v12, %v8013_v39  ;;  %v4572_v40 = vpop.f32.mrb[15].mxu1  ;;  %6588 = vmatmul.mubr.msk.f32.gmra.mrb[88].mxu0 %vm934_vm1, %v4687_v62  ;;  %v4689_v29 = vmax.f32 %v4657_v2, 0.0  ;;  %v4703_v62 = vld [vmem:[%s6993_s18 + $0x40] sm:$0xff] }
 0x345   : > { %v4688_v0 = vmax.f32 %v4656_v54, 0.0  ;;  %v6634_v23 = vadd.f32 %v4572_v40, %v8015_v6 }
 0x346   : > { %v4659_v13 = vadd.f32 %v6633_v63, %v8024_v26 }
 0x347   : > { %v4658_v5 = vadd.f32 %v6634_v23, %v8024_v26  ;;  %v6548_v37 = vpop.f32.mrb[16].mxu1  ;;  %6590 = vmatprep.mubr.msk.f32.mxu0 %vm934_vm1, %v4688_v0  ;;  %v4706_v0 = vld [vmem:[%s6993_s18 + $0x58] sm:$0xff] }
 0x348   : > { %v6635_v45 = vadd.f32 %v6548_v37, %v8017_v7  ;;  %v4582_v14 = vpop.f32.mrb[17].mxu1  ;;  %6591 = vmatmul.mubr.msk.f32.gmra.mrb[90].mxu0 %vm934_vm1, %v4689_v29  ;;  %v4691_v59 = vmax.f32 %v4659_v13, 0.0 }
 0x349   : > { %v4690_v39 = vmax.f32 %v4658_v5, 0.0  ;;  %v6636_v53 = vadd.f32 %v4582_v14, %v8019_v16  ;;  %v8111_v16 = vld [vmem:[%s8265_s8] ss:$0 sm:$0xff]  ;;  %v4705_v5 = vld [vmem:[%s6993_s18 + $0x50] sm:$0xff] }
 0x34a   : > { %v4661_v6 = vadd.f32 %v6635_v45, %v8024_v26 }
 0x34b   : > { %v4660_v8 = vadd.f32 %v6636_v53, %v8024_v26  ;;  %6593 = vmatprep.mubr.msk.f32.mxu0 %vm934_vm1, %v4690_v39 }
 0x34c   : > { %6594 = vmatmul.mubr.msk.f32.gmra.mrb[92].mxu0 %vm934_vm1, %v4691_v59  ;;  %v4693_v7 = vmax.f32 %v4661_v6, 0.0  ;;  %v4708_v59 = vld [vmem:[%s6993_s18 + $0x68] sm:$0xff] }
 0x34d   : > { %v4692_v48 = vmax.f32 %v4660_v8, 0.0 }
 0x34f   : > { %6596 = vmatprep.mubr.msk.f32.mxu0 %vm934_vm1, %v4692_v48 }
 0x350   : > { %6597 = vmatmul.mubr.msk.f32.gmra.mrb[94].mxu0 %vm934_vm1, %v4693_v7  ;;  %v4707_v7 = vld [vmem:[%s6993_s18 + $0x60] sm:$0xff] }
 0x3e7   : > { %v6553_v22 = vpop.f32.mrb[64].mxu0 }
 0x3e8   : > { %v4905_v26 = vadd.f32 %v6553_v22, %v8111_v16  ;;  %v4899_v49 = vpop.f32.mrb[65].mxu0 }
 0x3e9   : > { %v4900_v32 = vadd.f32 %v8111_v16, %v4899_v49 }
 0x3ea   : > { %v5059_v36 = vadd.f32 %v4905_v26, %v4696_v18 }
 0x3eb   : > { %v5058_v43 = vadd.f32 %v4900_v32, %v4695_v30  ;;  %v6556_v51 = vpop.f32.mrb[66].mxu0  ;;  %v4710_v32 = vld [vmem:[%s6993_s18 + $0x78] sm:$0xff] }
 0x3ec   : > { %v5091_v1 = vmax.f32 %v5059_v36, 0.0  ;;  %v4915_v9 = vadd.f32 %v6556_v51, %v8111_v16  ;;  %v4909_v17 = vpop.f32.mrb[67].mxu0  ;;  %v4709_v51 = vld [vmem:[%s6993_s18 + $0x70] sm:$0xff] }
 0x3ed   : > { %v5090_v27 = vmax.f32 %v5058_v43, 0.0  ;;  %v4910_v20 = vadd.f32 %v8111_v16, %v4909_v17 }
 0x3ee   : > { %5123 = vst.msk [vmem:[%s8122_s11 + $0x8] sm:$0xff] %vm579_vm0, %v5091_v1  ;;  %v5061_v4 = vadd.f32 %v4915_v9, %v4698_v56 }
 0x3ef   : > { %5122 = vst.msk [vmem:[%s8122_s11] sm:$0xff] %vm579_vm0, %v5090_v27  ;;  %v5060_v21 = vadd.f32 %v4910_v20, %v4697_v3  ;;  %v6559_v47 = vpop.f32.mrb[68].mxu0  ;;  %v4712_v20 = vld [vmem:[%s6993_s18 + $0x88] sm:$0xff] }
 0x3f0   : > { %v5093_v11 = vmax.f32 %v5061_v4, 0.0  ;;  %v4925_v58 = vadd.f32 %v6559_v47, %v8111_v16  ;;  %v4919_v52 = vpop.f32.mrb[69].mxu0  ;;  %v4711_v47 = vld [vmem:[%s6993_s18 + $0x80] sm:$0xff] }
 0x3f1   : > { %v5092_v19 = vmax.f32 %v5060_v21, 0.0  ;;  %v4920_v61 = vadd.f32 %v8111_v16, %v4919_v52 }
 0x3f2   : > { %5125 = vst.msk [vmem:[%s8122_s11 + $0x18] sm:$0xff] %vm579_vm0, %v5093_v11  ;;  %v5063_v24 = vadd.f32 %v4925_v58, %v4700_v31 }
 0x3f3   : > { %5124 = vst.msk [vmem:[%s8122_s11 + $0x10] sm:$0xff] %vm579_vm0, %v5092_v19  ;;  %v5062_v38 = vadd.f32 %v4920_v61, %v4699_v44  ;;  %v6562_v41 = vpop.f32.mrb[70].mxu0  ;;  %v4714_v61 = vld [vmem:[%s6993_s18 + $0x98] sm:$0xff] }
 0x3f4   : > { %v5095_v55 = vmax.f32 %v5063_v24, 0.0  ;;  %v4935_v60 = vadd.f32 %v6562_v41, %v8111_v16  ;;  %v4929_v57 = vpop.f32.mrb[71].mxu0  ;;  %v4713_v41 = vld [vmem:[%s6993_s18 + $0x90] sm:$0xff] }
 0x3f5   : > { %v5094_v10 = vmax.f32 %v5062_v38, 0.0  ;;  %v4930_v50 = vadd.f32 %v8111_v16, %v4929_v57 }
 0x3f6   : > { %5127 = vst.msk [vmem:[%s8122_s11 + $0x28] sm:$0xff] %vm579_vm0, %v5095_v55  ;;  %v5065_v35 = vadd.f32 %v4935_v60, %v4702_v25 }
 0x3f7   : > { %5126 = vst.msk [vmem:[%s8122_s11 + $0x20] sm:$0xff] %vm579_vm0, %v5094_v10  ;;  %v5064_v15 = vadd.f32 %v4930_v50, %v4701_v33  ;;  %v6565_v28 = vpop.f32.mrb[72].mxu0  ;;  %v4716_v50 = vld [vmem:[%s6993_s18 + $0xa8] sm:$0xff] }
 0x3f8   : > { %v5097_v46 = vmax.f32 %v5065_v35, 0.0  ;;  %v4945_v34 = vadd.f32 %v6565_v28, %v8111_v16  ;;  %v4939_v2 = vpop.f32.mrb[73].mxu0  ;;  %v4715_v28 = vld [vmem:[%s6993_s18 + $0xa0] sm:$0xff] }
 0x3f9   : > { %v5096_v54 = vmax.f32 %v5064_v15, 0.0  ;;  %v4940_v12 = vadd.f32 %v8111_v16, %v4939_v2 }
 0x3fa   : > { %5129 = vst.msk [vmem:[%s8122_s11 + $0x38] sm:$0xff] %vm579_vm0, %v5097_v46  ;;  %v5067_v63 = vadd.f32 %v4945_v34, %v4704_v42 }
 0x3fb   : > { %5128 = vst.msk [vmem:[%s8122_s11 + $0x30] sm:$0xff] %vm579_vm0, %v5096_v54  ;;  %v5066_v40 = vadd.f32 %v4940_v12, %v4703_v62  ;;  %v6568_v23 = vpop.f32.mrb[74].mxu0  ;;  %v4718_v12 = vld [vmem:[%s6993_s18 + $0xb8] sm:$0xff] }
 0x3fc   : > { %v5099_v29 = vmax.f32 %v5067_v63, 0.0  ;;  %v4955_v13 = vadd.f32 %v6568_v23, %v8111_v16  ;;  %v4949_v37 = vpop.f32.mrb[75].mxu0  ;;  %v4717_v23 = vld [vmem:[%s6993_s18 + $0xb0] sm:$0xff] }
 0x3fd   : > { %v5098_v45 = vmax.f32 %v5066_v40, 0.0  ;;  %v4950_v14 = vadd.f32 %v8111_v16, %v4949_v37 }
 0x3fe   : > { %5131 = vst.msk [vmem:[%s8122_s11 + $0x48] sm:$0xff] %vm579_vm0, %v5099_v29  ;;  %v5069_v39 = vadd.f32 %v4955_v13, %v4706_v0 }
 0x3ff   : > { %5130 = vst.msk [vmem:[%s8122_s11 + $0x40] sm:$0xff] %vm579_vm0, %v5098_v45  ;;  %v5068_v53 = vadd.f32 %v4950_v14, %v4705_v5  ;;  %v6571_v6 = vpop.f32.mrb[76].mxu0  ;;  %v4720_v14 = vld [vmem:[%s6993_s18 + $0xc8] sm:$0xff] }
 0x400   : > { %v5101_v8 = vmax.f32 %v5069_v39, 0.0  ;;  %v4965_v48 = vadd.f32 %v6571_v6, %v8111_v16  ;;  %v4959_v18 = vpop.f32.mrb[77].mxu0  ;;  %v4719_v6 = vld [vmem:[%s6993_s18 + $0xc0] sm:$0xff] }
 0x401   : > { %v5100_v22 = vmax.f32 %v5068_v53, 0.0  ;;  %v4960_v26 = vadd.f32 %v8111_v16, %v4959_v18 }
 0x402   : > { %5133 = vst.msk [vmem:[%s8122_s11 + $0x58] sm:$0xff] %vm579_vm0, %v5101_v8  ;;  %v5071_v30 = vadd.f32 %v4965_v48, %v4708_v59 }
 0x403   : > { %5132 = vst.msk [vmem:[%s8122_s11 + $0x50] sm:$0xff] %vm579_vm0, %v5100_v22  ;;  %v5070_v49 = vadd.f32 %v4960_v26, %v4707_v7  ;;  %v6574_v36 = vpop.f32.mrb[78].mxu0  ;;  %v4722_v26 = vld [vmem:[%s6993_s18 + $0xd8] sm:$0xff] }
 0x404   : > { %v5103_v43 = vmax.f32 %v5071_v30, 0.0  ;;  %v4975_v56 = vadd.f32 %v6574_v36, %v8111_v16  ;;  %v4969_v1 = vpop.f32.mrb[79].mxu0  ;;  %v4721_v36 = vld [vmem:[%s6993_s18 + $0xd0] sm:$0xff] }
 0x405   : > { %v5102_v9 = vmax.f32 %v5070_v49, 0.0  ;;  %v4970_v3 = vadd.f32 %v8111_v16, %v4969_v1 }
 0x406   : > { %5135 = vst.msk [vmem:[%s8122_s11 + $0x68] sm:$0xff] %vm579_vm0, %v5103_v43  ;;  %v5073_v17 = vadd.f32 %v4975_v56, %v4710_v32 }
 0x407   : > { %5134 = vst.msk [vmem:[%s8122_s11 + $0x60] sm:$0xff] %vm579_vm0, %v5102_v9  ;;  %v5072_v27 = vadd.f32 %v4970_v3, %v4709_v51  ;;  %v6577_v4 = vpop.f32.mrb[80].mxu0  ;;  %v4724_v3 = vld [vmem:[%s6993_s18 + $0xe8] sm:$0xff] }
 0x408   : > { %v5105_v21 = vmax.f32 %v5073_v17, 0.0  ;;  %v4985_v31 = vadd.f32 %v6577_v4, %v8111_v16  ;;  %v4979_v11 = vpop.f32.mrb[81].mxu0  ;;  %v4723_v4 = vld [vmem:[%s6993_s18 + $0xe0] sm:$0xff] }
 0x409   : > { %v5104_v58 = vmax.f32 %v5072_v27, 0.0  ;;  %v4980_v44 = vadd.f32 %v8111_v16, %v4979_v11 }
 0x40a   : > { %5137 = vst.msk [vmem:[%s8122_s11 + $0x78] sm:$0xff] %vm579_vm0, %v5105_v21  ;;  %v5075_v52 = vadd.f32 %v4985_v31, %v4712_v20 }
 0x40b   : > { %5136 = vst.msk [vmem:[%s8122_s11 + $0x70] sm:$0xff] %vm579_vm0, %v5104_v58  ;;  %v5074_v19 = vadd.f32 %v4980_v44, %v4711_v47  ;;  %v6580_v24 = vpop.f32.mrb[82].mxu0  ;;  %v4726_v44 = vld [vmem:[%s6993_s18 + $0xf8] sm:$0xff] }
 0x40c   : > { %v5107_v38 = vmax.f32 %v5075_v52, 0.0  ;;  %v4995_v25 = vadd.f32 %v6580_v24, %v8111_v16  ;;  %v4989_v55 = vpop.f32.mrb[83].mxu0  ;;  %v4725_v24 = vld [vmem:[%s6993_s18 + $0xf0] sm:$0xff] }
 0x40d   : > { %v5106_v60 = vmax.f32 %v5074_v19, 0.0  ;;  %v4990_v33 = vadd.f32 %v8111_v16, %v4989_v55 }
 0x40e   : > { %5139 = vst.msk [vmem:[%s8122_s11 + $0x88] sm:$0xff] %vm579_vm0, %v5107_v38  ;;  %v5077_v57 = vadd.f32 %v4995_v25, %v4714_v61 }
 0x40f   : > { %5138 = vst.msk [vmem:[%s8122_s11 + $0x80] sm:$0xff] %vm579_vm0, %v5106_v60  ;;  %v5076_v10 = vadd.f32 %v4990_v33, %v4713_v41  ;;  %v6583_v35 = vpop.f32.mrb[84].mxu0 }
 0x410   : > { %v5109_v15 = vmax.f32 %v5077_v57, 0.0  ;;  %v5005_v42 = vadd.f32 %v6583_v35, %v8111_v16  ;;  %v4999_v46 = vpop.f32.mrb[85].mxu0 }
 0x411   : > { %v5108_v34 = vmax.f32 %v5076_v10, 0.0  ;;  %v5000_v62 = vadd.f32 %v8111_v16, %v4999_v46 }
 0x412   : > { %5141 = vst.msk [vmem:[%s8122_s11 + $0x98] sm:$0xff] %vm579_vm0, %v5109_v15  ;;  %v5079_v2 = vadd.f32 %v5005_v42, %v4716_v50 }
 0x413   : > { %5140 = vst.msk [vmem:[%s8122_s11 + $0x90] sm:$0xff] %vm579_vm0, %v5108_v34  ;;  %v5078_v54 = vadd.f32 %v5000_v62, %v4715_v28  ;;  %v6586_v63 = vpop.f32.mrb[86].mxu0 }
 0x414   : > { %v5111_v40 = vmax.f32 %v5079_v2, 0.0  ;;  %v5015_v0 = vadd.f32 %v6586_v63, %v8111_v16  ;;  %v5009_v29 = vpop.f32.mrb[87].mxu0 }
 0x415   : > { %v5110_v13 = vmax.f32 %v5078_v54, 0.0  ;;  %v5010_v5 = vadd.f32 %v8111_v16, %v5009_v29 }
 0x416   : > { %5143 = vst.msk [vmem:[%s8122_s11 + $0xa8] sm:$0xff] %vm579_vm0, %v5111_v40  ;;  %v5081_v37 = vadd.f32 %v5015_v0, %v4718_v12 }
 0x417   : > { %5142 = vst.msk [vmem:[%s8122_s11 + $0xa0] sm:$0xff] %vm579_vm0, %v5110_v13  ;;  %v5080_v45 = vadd.f32 %v5010_v5, %v4717_v23  ;;  %v6589_v39 = vpop.f32.mrb[88].mxu0 }
 0x418   : > { %v5113_v53 = vmax.f32 %v5081_v37, 0.0  ;;  %v5025_v59 = vadd.f32 %v6589_v39, %v8111_v16  ;;  %v5019_v8 = vpop.f32.mrb[89].mxu0 }
 0x419   : > { %v5112_v48 = vmax.f32 %v5080_v45, 0.0  ;;  %v5020_v7 = vadd.f32 %v8111_v16, %v5019_v8 }
 0x41a   : > { %5145 = vst.msk [vmem:[%s8122_s11 + $0xb8] sm:$0xff] %vm579_vm0, %v5113_v53  ;;  %v5083_v18 = vadd.f32 %v5025_v59, %v4720_v14 }
 0x41b   : > { %5144 = vst.msk [vmem:[%s8122_s11 + $0xb0] sm:$0xff] %vm579_vm0, %v5112_v48  ;;  %v5082_v22 = vadd.f32 %v5020_v7, %v4719_v6  ;;  %v6592_v30 = vpop.f32.mrb[90].mxu0 }
 0x41c   : > { %v5115_v49 = vmax.f32 %v5083_v18, 0.0  ;;  %v5035_v32 = vadd.f32 %v6592_v30, %v8111_v16  ;;  %v5029_v43 = vpop.f32.mrb[91].mxu0 }
 0x41d   : > { %v5114_v56 = vmax.f32 %v5082_v22, 0.0  ;;  %v5030_v51 = vadd.f32 %v8111_v16, %v5029_v43 }
 0x41e   : > { %5147 = vst.msk [vmem:[%s8122_s11 + $0xc8] sm:$0xff] %vm579_vm0, %v5115_v49  ;;  %v5085_v1 = vadd.f32 %v5035_v32, %v4722_v26 }
 0x41f   : > { %5146 = vst.msk [vmem:[%s8122_s11 + $0xc0] sm:$0xff] %vm579_vm0, %v5114_v56  ;;  %v5084_v9 = vadd.f32 %v5030_v51, %v4721_v36  ;;  %v6595_v17 = vpop.f32.mrb[92].mxu0 }
 0x420   : > { %v5117_v27 = vmax.f32 %v5085_v1, 0.0  ;;  %v5045_v20 = vadd.f32 %v6595_v17, %v8111_v16  ;;  %v5039_v21 = vpop.f32.mrb[93].mxu0 }
 0x421   : > { %v5116_v31 = vmax.f32 %v5084_v9, 0.0  ;;  %v5040_v47 = vadd.f32 %v8111_v16, %v5039_v21 }
 0x422   : > { %5149 = vst.msk [vmem:[%s8122_s11 + $0xd8] sm:$0xff] %vm579_vm0, %v5117_v27  ;;  %v5087_v11 = vadd.f32 %v5045_v20, %v4724_v3 }
 0x423   : > { %5148 = vst.msk [vmem:[%s8122_s11 + $0xd0] sm:$0xff] %vm579_vm0, %v5116_v31  ;;  %v5086_v58 = vadd.f32 %v5040_v47, %v4723_v4  ;;  %v6598_v52 = vpop.f32.mrb[94].mxu0 }
 0x424   : > { %v5119_v19 = vmax.f32 %v5087_v11, 0.0  ;;  %v5055_v61 = vadd.f32 %v6598_v52, %v8111_v16  ;;  %v5049_v38 = vpop.f32.mrb[95].mxu0 }
 0x425   : > { %v5118_v25 = vmax.f32 %v5086_v58, 0.0  ;;  %v5050_v41 = vadd.f32 %v8111_v16, %v5049_v38 }
 0x426   : > { %5151 = vst.msk [vmem:[%s8122_s11 + $0xe8] sm:$0xff] %vm579_vm0, %v5119_v19  ;;  %v5089_v55 = vadd.f32 %v5055_v61, %v4726_v44 }
 0x427   : > { %5150 = vst.msk [vmem:[%s8122_s11 + $0xe0] sm:$0xff] %vm579_vm0, %v5118_v25  ;;  %v5088_v60 = vadd.f32 %v5050_v41, %v4725_v24 }
 0x428   : > { %v5121_v33 = vmax.f32 %v5089_v55, 0.0 }
 0x429   : > { %v5120_v57 = vmax.f32 %v5088_v60, 0.0 }
 0x42a   : > { %5153 = vst.msk [vmem:[%s8122_s11 + $0xf8] sm:$0xff] %vm579_vm0, %v5121_v33 }
 0x42b   : > { %5152 = vst.msk [vmem:[%s8122_s11 + $0xf0] sm:$0xff] %vm579_vm0, %v5120_v57 }
 0x42c PF: > { %s19_s30 = sadd.s32 1, %s6908_s30   ;;  %s8315_s28 = smov %s6904_s29 }
 0x42d   : > { %p16_p5 = scmp.ge.s32.totalorder %s19_s30, 4   ;;  %s8316_s29 = smov %s8318_s10 }
 0x42f   :  { %18 = sbr.rel (!%p16_p5) target bundleno = 2 (0x2), region = 112 }

</bundles_post_ra>
